<compile_context>
chip_gen: v7x
topology: tpu7x:2x2x1
jax: 0.10.0
libtpu: 0.0.40
codegen_flags: <defaults>
</compile_context>

<pallas_src>
import functools

import jax
import jax.numpy as jnp
import numpy as np
from jax.experimental import pallas as pl
from jax.experimental.pallas import tpu as pltpu


def _lstm_kernel(xproj0_ref, lens_ref, w_ihr_ref, w_hh_ref, b_ref,
                 out_ref, h_s, c_s, xp_s):
    """Multi-layer LSTM over a padded batch block, with length masking.

    xproj0_ref: (T, Bt, 4H) f32  layer-0 input projection + bias (precomputed)
    lens_ref  : (Bt, 1)     i32  seq_lengths for this batch block
    w_ihr_ref : (max(L-1,1), H, 4H) f32  input weights, layers 1..L-1
    w_hh_ref  : (L, H, 4H)  f32  hidden weights
    b_ref     : (L, 1, 4H)  f32  combined bias (b_ih + b_hh)
    out_ref   : (T, Bt, H)  f32  hidden states of the last layer (time-major)
    h_s, c_s  : (Bt, H)     f32  scratch LSTM state
    xp_s      : (T, Bt, 4H) f32  scratch: batched input projection, layers >= 1
    """
    T = out_ref.shape[0]
    Bt = out_ref.shape[1]
    H = out_ref.shape[2]
    num_layers = w_hh_ref.shape[0]

    lens = lens_ref[...]                              # (Bt, 1) i32, loaded once

    def run_layer(xp_ref, w_hh_l):
        # Recurrent part of one layer; xp_ref[t] already holds x_t @ W_ih + b.
        h_s[...] = jnp.zeros_like(h_s)
        c_s[...] = jnp.zeros_like(c_s)

        def step(t, carry):
            h_prev = h_s[...]
            c_prev = c_s[...]
            gates = xp_ref[t] + jnp.dot(h_prev, w_hh_l,
                                        preferred_element_type=jnp.float32)
            sg = jax.nn.sigmoid(gates)                # full-width EUP: i, f, o
            tg = jnp.tanh(gates)                      # full-width EUP: g
            i = sg[:, 0:H]
            f = sg[:, H:2 * H]
            g = tg[:, 2 * H:3 * H]
            o = sg[:, 3 * H:4 * H]
            c_new = f * c_prev + i * g
            h_new = o * jnp.tanh(c_new)
            mask = t < lens                           # (Bt, 1) bool
            h_s[...] = jnp.where(mask, h_new, h_prev)   # freeze past length
            c_s[...] = jnp.where(mask, c_new, c_prev)
            out_ref[t] = jnp.where(mask, h_new, 0.0)    # pad_packed -> zeros
            return carry

        jax.lax.fori_loop(0, T, step, 0, unroll=True)

    # ---- layer 0: projection precomputed in the wrapper (lane-dense 4H) ----
    run_layer(xproj0_ref, w_hh_ref[0])

    # ---- layers 1 .. L-1: one batched MXU input projection per layer ----
    for l in range(1, num_layers):
        prev = out_ref[...].reshape(T * Bt, H)        # previous layer outputs
        xp = jnp.dot(prev, w_ihr_ref[l - 1],
                     preferred_element_type=jnp.float32)   # (T*Bt, 4H)
        xp_s[...] = xp.reshape(T, Bt, 4 * H) + b_ref[l]    # bias folded once
        run_layer(xp_s, w_hh_ref[l])


@functools.partial(jax.jit,
                   static_argnames=("hidden_size", "num_layers", "batch_tile"))
def get_hidden_state(rnn_events, seq_lengths, w_ih0, w_ihr, w_hh, b,
                     *, hidden_size, num_layers, batch_tile=None):
    """rnn_events: (B, T) f32, seq_lengths: (B,) i32 -> (B, T, H) f32."""
    B, T = rnn_events.shape
    H = hidden_size
    G = 4 * H
    Bt = B if batch_tile is None else batch_tile
    assert B % Bt == 0 and (Bt == B or Bt % 8 == 0)

    # Layer-0 input projection with bias folded in, time-major, lane-dense 4H.
    x_tm = jnp.transpose(rnn_events, (1, 0))                        # (T, B)
    xproj0 = (x_tm[:, :, None] * w_ih0.reshape(1, 1, G)
              + b[0].reshape(1, 1, G)).astype(jnp.float32)          # (T, B, 4H)

    lens = seq_lengths.astype(jnp.int32)[:, None]                    # (B, 1)

    # Keep a non-empty weight array even for a single-layer net (unused then).
    w_ihr_k = w_ihr if num_layers > 1 else jnp.zeros((1, H, G), jnp.float32)

    out_tm = pl.pallas_call(
        _lstm_kernel,
        out_shape=jax.ShapeDtypeStruct((T, B, H), jnp.float32),
        grid_spec=pltpu.PrefetchScalarGridSpec(
            num_scalar_prefetch=0,
            grid=(B // Bt,),
            in_specs=[
                pl.BlockSpec((T, Bt, G), lambda i: (0, i, 0)),       # xproj0
                pl.BlockSpec((Bt, 1), lambda i: (i, 0)),             # lens
                pl.BlockSpec(w_ihr_k.shape, lambda i: (0, 0, 0)),    # w_ihr
                pl.BlockSpec(w_hh.shape, lambda i: (0, 0, 0)),       # w_hh
                pl.BlockSpec(b.shape, lambda i: (0, 0, 0)),          # bias
            ],
            out_specs=pl.BlockSpec((T, Bt, H), lambda i: (0, i, 0)),
            scratch_shapes=[
                pltpu.VMEM((Bt, H), jnp.float32),        # h state
                pltpu.VMEM((Bt, H), jnp.float32),        # c state
                pltpu.VMEM((T, Bt, G), jnp.float32),     # batched xproj, l >= 1
            ]),
        compiler_params=pltpu.CompilerParams(
            dimension_semantics=("parallel",)),
    )(xproj0, lens, w_ihr_k, w_hh, b)

    # Batch-first to match pad_packed_sequence(batch_first=True).
    return jnp.transpose(out_tm, (1, 0, 2))                          # (B, T, H)


def lstm_reference(rnn_events, seq_lengths, w_ih0, w_ihr, w_hh, b):
    """Pure-JAX reference matching torch.nn.LSTM + pack/pad_packed semantics."""
    B, T = rnn_events.shape
    L = w_hh.shape[0]
    H = w_hh.shape[1]
    layer_in = rnn_events[..., None]                                 # (B, T, 1)
    lens = seq_lengths.astype(jnp.int32)
    for l in range(L):
        w_ih = w_ih0 if l == 0 else w_ihr[l - 1]
        h = jnp.zeros((B, H), jnp.float32)
        c = jnp.zeros((B, H), jnp.float32)
        outs = []
        for t in range(T):
            xproj = layer_in[:, t, :] @ w_ih
            gates = xproj + h @ w_hh[l] + b[l]
            i = jax.nn.sigmoid(gates[:, :H])
            f = jax.nn.sigmoid(gates[:, H:2 * H])
            g = jnp.tanh(gates[:, 2 * H:3 * H])
            o = jax.nn.sigmoid(gates[:, 3 * H:])
            c_new = f * c + i * g
            h_new = o * jnp.tanh(c_new)
            mask = (t < lens)[:, None]
            h = jnp.where(mask, h_new, h)
            c = jnp.where(mask, c_new, c)
            outs.append(jnp.where(mask, h_new, 0.0))
        layer_in = jnp.stack(outs, axis=1)
    return layer_in


if __name__ == "__main__":
    # Small shapes implied by the forward: batch B, seq T, hidden H, layers L.
    B, T = 8, 8
    H = 32                 # recurrent_output_size  (4H = 128 -> lane dense)
    L = 2                  # recurrent_num_layers

    key = jax.random.PRNGKey(0)
    k_x, k_i0, k_ir, k_hh, k_bi, k_bh = jax.random.split(key, 6)

    # batch.rnn_events (inter-event times) and seq_lengths (sorted descending,
    # as pack_padded_sequence(enforce_sorted=True) requires).
    rnn_events = jax.random.uniform(k_x, (B, T), jnp.float32)
    seq_lengths = jnp.array([8, 8, 7, 6, 5, 4, 3, 2], jnp.int32)

    # Deterministic LSTM parameters, PyTorch-style uniform(-1/sqrt(H), 1/sqrt(H)).
    scale = 1.0 / np.sqrt(H)
    w_ih0 = jax.random.uniform(k_i0, (1, 4 * H), jnp.float32, -scale, scale)
    w_ihr = jax.random.uniform(k_ir, (L - 1, H, 4 * H), jnp.float32, -scale, scale)
    w_hh = jax.random.uniform(k_hh, (L, H, 4 * H), jnp.float32, -scale, scale)
    b = (jax.random.uniform(k_bi, (L, 1, 4 * H), jnp.float32, -scale, scale)
         + jax.random.uniform(k_bh, (L, 1, 4 * H), jnp.float32, -scale, scale))

    h_kernel = get_hidden_state(rnn_events, seq_lengths, w_ih0, w_ihr, w_hh, b,
                                hidden_size=H, num_layers=L)
    h_kernel = jax.block_until_ready(h_kernel)

    h_ref = lstm_reference(rnn_events, seq_lengths, w_ih0, w_ihr, w_hh, b)
    np.testing.assert_allclose(np.asarray(h_kernel), np.asarray(h_ref),
                               atol=1e-5, rtol=1e-5)
    print("KERNEL_OK")
</pallas_src>

<mosaic_0001>
module attributes {stable_mosaic.version = 11 : i64} {
  func.func @_lstm_kernel(%arg0: i32, %arg1: memref<8x8x128xf32, #tpu.memory_space<vmem>>, %arg2: memref<8x1xi32, #tpu.memory_space<vmem>>, %arg3: memref<1x32x128xf32, #tpu.memory_space<vmem>>, %arg4: memref<2x32x128xf32, #tpu.memory_space<vmem>>, %arg5: memref<2x1x128xf32, #tpu.memory_space<vmem>>, %arg6: memref<8x8x32xf32, #tpu.memory_space<vmem>>, %arg7: memref<8x32xf32, #tpu.memory_space<vmem>>, %arg8: memref<8x32xf32, #tpu.memory_space<vmem>>, %arg9: memref<8x8x128xf32, #tpu.memory_space<vmem>>) attributes {dimension_semantics = [#tpu.dimension_semantics<parallel>], iteration_bounds = array<i64: 1>, scalar_prefetch = 0 : i64, scratch_operands = 3 : i64, tpu.core_type = #tpu.core_type<tc>, window_params = [{transform_indices = @transform_0, window_bounds = array<i64: 8, 8, 128>}, {transform_indices = @transform_1, window_bounds = array<i64: 8, 1>}, {pipeline_mode = #tpu.pipeline_mode<synchronous>, transform_indices = @transform_2, window_bounds = array<i64: 1, 32, 128>}, {pipeline_mode = #tpu.pipeline_mode<synchronous>, transform_indices = @transform_3, window_bounds = array<i64: 2, 32, 128>}, {pipeline_mode = #tpu.pipeline_mode<synchronous>, transform_indices = @transform_4, window_bounds = array<i64: 2, 1, 128>}, {transform_indices = @transform_5, window_bounds = array<i64: 8, 8, 32>}]} {
    %c0 = arith.constant 0 : index
    %c0_0 = arith.constant 0 : index
    %0 = vector.load %arg2[%c0, %c0_0] : memref<8x1xi32, #tpu.memory_space<vmem>>, vector<8x1xi32>
    %c0_1 = arith.constant 0 : index
    %c0_2 = arith.constant 0 : index
    %c0_3 = arith.constant 0 : index
    %1 = vector.load %arg4[%c0_1, %c0_2, %c0_3] : memref<2x32x128xf32, #tpu.memory_space<vmem>>, vector<1x32x128xf32>
    %2 = vector.shape_cast %1 : vector<1x32x128xf32> to vector<32x128xf32>
    %cst = arith.constant 0.000000e+00 : f32
    %3 = vector.broadcast %cst : f32 to vector<8x32xf32>
    %c0_4 = arith.constant 0 : index
    %c0_5 = arith.constant 0 : index
    %4 = vector.load %arg7[%c0_4, %c0_5] : memref<8x32xf32, #tpu.memory_space<vmem>>, vector<8x32xf32>
    tpu.vector_store %arg7[%c0_4, %c0_5], %3 {strides = array<i32>} : memref<8x32xf32, #tpu.memory_space<vmem>>, vector<8x32xf32>,
    %cst_6 = arith.constant 0.000000e+00 : f32
    %5 = vector.broadcast %cst_6 : f32 to vector<8x32xf32>
    %c0_7 = arith.constant 0 : index
    %c0_8 = arith.constant 0 : index
    %6 = vector.load %arg8[%c0_7, %c0_8] : memref<8x32xf32, #tpu.memory_space<vmem>>, vector<8x32xf32>
    tpu.vector_store %arg8[%c0_7, %c0_8], %5 {strides = array<i32>} : memref<8x32xf32, #tpu.memory_space<vmem>>, vector<8x32xf32>,
    %c0_i32 = arith.constant 0 : i32
    %c0_9 = arith.constant 0 : index
    %c0_10 = arith.constant 0 : index
    %7 = vector.load %arg7[%c0_9, %c0_10] : memref<8x32xf32, #tpu.memory_space<vmem>>, vector<8x32xf32>
    %c0_11 = arith.constant 0 : index
    %c0_12 = arith.constant 0 : index
    %8 = vector.load %arg8[%c0_11, %c0_12] : memref<8x32xf32, #tpu.memory_space<vmem>>, vector<8x32xf32>
    %9 = arith.index_cast %c0_i32 : i32 to index
    %c0_13 = arith.constant 0 : index
    %c0_14 = arith.constant 0 : index
    %10 = vector.load %arg1[%9, %c0_13, %c0_14] : memref<8x8x128xf32, #tpu.memory_space<vmem>>, vector<1x8x128xf32>
    %11 = vector.shape_cast %10 : vector<1x8x128xf32> to vector<8x128xf32>
    %cst_15 = arith.constant dense<0.000000e+00> : vector<8x128xf32>
    %12 = tpu.matmul %7, %2, %cst_15 {dimension_numbers = #tpu.dot_dimension_numbers<[1], [0], [0], [1], [0, 0, 1, 1], [], []>} : vector<8x32xf32>, vector<32x128xf32>, vector<8x128xf32> -> vector<8x128xf32>
    %13 = arith.addf %11, %12 : vector<8x128xf32>
    %14 = arith.negf %13 : vector<8x128xf32>
    %15 = math.exp %14 : vector<8x128xf32>
    %cst_16 = arith.constant 1.000000e+00 : f32
    %16 = vector.broadcast %cst_16 : f32 to vector<8x128xf32>
    %17 = arith.addf %16, %15 : vector<8x128xf32>
    %18 = arith.divf %16, %17 : vector<8x128xf32>
    %19 = math.tanh %13 : vector<8x128xf32>
    %20 = vector.extract_strided_slice %18 {offsets = [0, 0], sizes = [8, 32], strides = [1, 1]} : vector<8x128xf32> to vector<8x32xf32>
    %21 = vector.extract_strided_slice %18 {offsets = [0, 32], sizes = [8, 32], strides = [1, 1]} : vector<8x128xf32> to vector<8x32xf32>
    %22 = vector.extract_strided_slice %19 {offsets = [0, 64], sizes = [8, 32], strides = [1, 1]} : vector<8x128xf32> to vector<8x32xf32>
    %23 = vector.extract_strided_slice %18 {offsets = [0, 96], sizes = [8, 32], strides = [1, 1]} : vector<8x128xf32> to vector<8x32xf32>
    %24 = arith.mulf %21, %8 : vector<8x32xf32>
    %25 = arith.mulf %20, %22 : vector<8x32xf32>
    %26 = arith.addf %24, %25 : vector<8x32xf32>
    %27 = math.tanh %26 : vector<8x32xf32>
    %28 = arith.mulf %23, %27 : vector<8x32xf32>
    %29 = vector.broadcast %c0_i32 : i32 to vector<8x1xi32>
    %30 = arith.cmpi slt, %29, %0 : vector<8x1xi32>
    %31 = vector.shape_cast %30 : vector<8x1xi1> to vector<8x1xi1>
    %32 = vector.broadcast %31 : vector<8x1xi1> to vector<8x32xi1>
    %33 = arith.select %32, %28, %7 : vector<8x32xi1>, vector<8x32xf32>
    %c0_17 = arith.constant 0 : index
    %c0_18 = arith.constant 0 : index
    %34 = vector.load %arg7[%c0_17, %c0_18] : memref<8x32xf32, #tpu.memory_space<vmem>>, vector<8x32xf32>
    tpu.vector_store %arg7[%c0_17, %c0_18], %33 {strides = array<i32>} : memref<8x32xf32, #tpu.memory_space<vmem>>, vector<8x32xf32>,
    %35 = vector.shape_cast %30 : vector<8x1xi1> to vector<8x1xi1>
    %36 = vector.broadcast %35 : vector<8x1xi1> to vector<8x32xi1>
    %37 = arith.select %36, %26, %8 : vector<8x32xi1>, vector<8x32xf32>
    %c0_19 = arith.constant 0 : index
    %c0_20 = arith.constant 0 : index
    %38 = vector.load %arg8[%c0_19, %c0_20] : memref<8x32xf32, #tpu.memory_space<vmem>>, vector<8x32xf32>
    tpu.vector_store %arg8[%c0_19, %c0_20], %37 {strides = array<i32>} : memref<8x32xf32, #tpu.memory_space<vmem>>, vector<8x32xf32>,
    %cst_21 = arith.constant 0.000000e+00 : f32
    %39 = vector.shape_cast %30 : vector<8x1xi1> to vector<8x1xi1>
    %40 = vector.broadcast %39 : vector<8x1xi1> to vector<8x32xi1>
    %41 = vector.broadcast %cst_21 : f32 to vector<8x32xf32>
    %42 = arith.select %40, %28, %41 : vector<8x32xi1>, vector<8x32xf32>
    %43 = arith.index_cast %c0_i32 : i32 to index
    %c0_22 = arith.constant 0 : index
    %c0_23 = arith.constant 0 : index
    %44 = vector.load %arg6[%43, %c0_22, %c0_23] : memref<8x8x32xf32, #tpu.memory_space<vmem>>, vector<1x8x32xf32>
    %45 = vector.shape_cast %44 : vector<1x8x32xf32> to vector<8x32xf32>
    %46 = vector.shape_cast %42 : vector<8x32xf32> to vector<1x8x32xf32>
    tpu.vector_store %arg6[%43, %c0_22, %c0_23], %46 {strides = array<i32>} : memref<8x8x32xf32, #tpu.memory_space<vmem>>, vector<1x8x32xf32>,
    %c1_i32 = arith.constant 1 : i32
    %c0_24 = arith.constant 0 : index
    %c0_25 = arith.constant 0 : index
    %47 = vector.load %arg7[%c0_24, %c0_25] : memref<8x32xf32, #tpu.memory_space<vmem>>, vector<8x32xf32>
    %c0_26 = arith.constant 0 : index
    %c0_27 = arith.constant 0 : index
    %48 = vector.load %arg8[%c0_26, %c0_27] : memref<8x32xf32, #tpu.memory_space<vmem>>, vector<8x32xf32>
    %49 = arith.index_cast %c1_i32 : i32 to index
    %c0_28 = arith.constant 0 : index
    %c0_29 = arith.constant 0 : index
    %50 = vector.load %arg1[%49, %c0_28, %c0_29] : memref<8x8x128xf32, #tpu.memory_space<vmem>>, vector<1x8x128xf32>
    %51 = vector.shape_cast %50 : vector<1x8x128xf32> to vector<8x128xf32>
    %cst_30 = arith.constant dense<0.000000e+00> : vector<8x128xf32>
    %52 = tpu.matmul %47, %2, %cst_30 {dimension_numbers = #tpu.dot_dimension_numbers<[1], [0], [0], [1], [0, 0, 1, 1], [], []>} : vector<8x32xf32>, vector<32x128xf32>, vector<8x128xf32> -> vector<8x128xf32>
    %53 = arith.addf %51, %52 : vector<8x128xf32>
    %54 = arith.negf %53 : vector<8x128xf32>
    %55 = math.exp %54 : vector<8x128xf32>
    %cst_31 = arith.constant 1.000000e+00 : f32
    %56 = vector.broadcast %cst_31 : f32 to vector<8x128xf32>
    %57 = arith.addf %56, %55 : vector<8x128xf32>
    %58 = arith.divf %56, %57 : vector<8x128xf32>
    %59 = math.tanh %53 : vector<8x128xf32>
    %60 = vector.extract_strided_slice %58 {offsets = [0, 0], sizes = [8, 32], strides = [1, 1]} : vector<8x128xf32> to vector<8x32xf32>
    %61 = vector.extract_strided_slice %58 {offsets = [0, 32], sizes = [8, 32], strides = [1, 1]} : vector<8x128xf32> to vector<8x32xf32>
    %62 = vector.extract_strided_slice %59 {offsets = [0, 64], sizes = [8, 32], strides = [1, 1]} : vector<8x128xf32> to vector<8x32xf32>
    %63 = vector.extract_strided_slice %58 {offsets = [0, 96], sizes = [8, 32], strides = [1, 1]} : vector<8x128xf32> to vector<8x32xf32>
    %64 = arith.mulf %61, %48 : vector<8x32xf32>
    %65 = arith.mulf %60, %62 : vector<8x32xf32>
    %66 = arith.addf %64, %65 : vector<8x32xf32>
    %67 = math.tanh %66 : vector<8x32xf32>
    %68 = arith.mulf %63, %67 : vector<8x32xf32>
    %69 = vector.broadcast %c1_i32 : i32 to vector<8x1xi32>
    %70 = arith.cmpi slt, %69, %0 : vector<8x1xi32>
    %71 = vector.shape_cast %70 : vector<8x1xi1> to vector<8x1xi1>
    %72 = vector.broadcast %71 : vector<8x1xi1> to vector<8x32xi1>
    %73 = arith.select %72, %68, %47 : vector<8x32xi1>, vector<8x32xf32>
    %c0_32 = arith.constant 0 : index
    %c0_33 = arith.constant 0 : index
    %74 = vector.load %arg7[%c0_32, %c0_33] : memref<8x32xf32, #tpu.memory_space<vmem>>, vector<8x32xf32>
    tpu.vector_store %arg7[%c0_32, %c0_33], %73 {strides = array<i32>} : memref<8x32xf32, #tpu.memory_space<vmem>>, vector<8x32xf32>,
    %75 = vector.shape_cast %70 : vector<8x1xi1> to vector<8x1xi1>
    %76 = vector.broadcast %75 : vector<8x1xi1> to vector<8x32xi1>
    %77 = arith.select %76, %66, %48 : vector<8x32xi1>, vector<8x32xf32>
    %c0_34 = arith.constant 0 : index
    %c0_35 = arith.constant 0 : index
    %78 = vector.load %arg8[%c0_34, %c0_35] : memref<8x32xf32, #tpu.memory_space<vmem>>, vector<8x32xf32>
    tpu.vector_store %arg8[%c0_34, %c0_35], %77 {strides = array<i32>} : memref<8x32xf32, #tpu.memory_space<vmem>>, vector<8x32xf32>,
    %cst_36 = arith.constant 0.000000e+00 : f32
    %79 = vector.shape_cast %70 : vector<8x1xi1> to vector<8x1xi1>
    %80 = vector.broadcast %79 : vector<8x1xi1> to vector<8x32xi1>
    %81 = vector.broadcast %cst_36 : f32 to vector<8x32xf32>
    %82 = arith.select %80, %68, %81 : vector<8x32xi1>, vector<8x32xf32>
    %83 = arith.index_cast %c1_i32 : i32 to index
    %c0_37 = arith.constant 0 : index
    %c0_38 = arith.constant 0 : index
    %84 = vector.load %arg6[%83, %c0_37, %c0_38] : memref<8x8x32xf32, #tpu.memory_space<vmem>>, vector<1x8x32xf32>
    %85 = vector.shape_cast %84 : vector<1x8x32xf32> to vector<8x32xf32>
    %86 = vector.shape_cast %82 : vector<8x32xf32> to vector<1x8x32xf32>
    tpu.vector_store %arg6[%83, %c0_37, %c0_38], %86 {strides = array<i32>} : memref<8x8x32xf32, #tpu.memory_space<vmem>>, vector<1x8x32xf32>,
    %c2_i32 = arith.constant 2 : i32
    %c0_39 = arith.constant 0 : index
    %c0_40 = arith.constant 0 : index
    %87 = vector.load %arg7[%c0_39, %c0_40] : memref<8x32xf32, #tpu.memory_space<vmem>>, vector<8x32xf32>
    %c0_41 = arith.constant 0 : index
    %c0_42 = arith.constant 0 : index
    %88 = vector.load %arg8[%c0_41, %c0_42] : memref<8x32xf32, #tpu.memory_space<vmem>>, vector<8x32xf32>
    %89 = arith.index_cast %c2_i32 : i32 to index
    %c0_43 = arith.constant 0 : index
    %c0_44 = arith.constant 0 : index
    %90 = vector.load %arg1[%89, %c0_43, %c0_44] : memref<8x8x128xf32, #tpu.memory_space<vmem>>, vector<1x8x128xf32>
    %91 = vector.shape_cast %90 : vector<1x8x128xf32> to vector<8x128xf32>
    %cst_45 = arith.constant dense<0.000000e+00> : vector<8x128xf32>
    %92 = tpu.matmul %87, %2, %cst_45 {dimension_numbers = #tpu.dot_dimension_numbers<[1], [0], [0], [1], [0, 0, 1, 1], [], []>} : vector<8x32xf32>, vector<32x128xf32>, vector<8x128xf32> -> vector<8x128xf32>
    %93 = arith.addf %91, %92 : vector<8x128xf32>
    %94 = arith.negf %93 : vector<8x128xf32>
    %95 = math.exp %94 : vector<8x128xf32>
    %cst_46 = arith.constant 1.000000e+00 : f32
    %96 = vector.broadcast %cst_46 : f32 to vector<8x128xf32>
    %97 = arith.addf %96, %95 : vector<8x128xf32>
    %98 = arith.divf %96, %97 : vector<8x128xf32>
    %99 = math.tanh %93 : vector<8x128xf32>
    %100 = vector.extract_strided_slice %98 {offsets = [0, 0], sizes = [8, 32], strides = [1, 1]} : vector<8x128xf32> to vector<8x32xf32>
    %101 = vector.extract_strided_slice %98 {offsets = [0, 32], sizes = [8, 32], strides = [1, 1]} : vector<8x128xf32> to vector<8x32xf32>
    %102 = vector.extract_strided_slice %99 {offsets = [0, 64], sizes = [8, 32], strides = [1, 1]} : vector<8x128xf32> to vector<8x32xf32>
    %103 = vector.extract_strided_slice %98 {offsets = [0, 96], sizes = [8, 32], strides = [1, 1]} : vector<8x128xf32> to vector<8x32xf32>
    %104 = arith.mulf %101, %88 : vector<8x32xf32>
    %105 = arith.mulf %100, %102 : vector<8x32xf32>
    %106 = arith.addf %104, %105 : vector<8x32xf32>
    %107 = math.tanh %106 : vector<8x32xf32>
    %108 = arith.mulf %103, %107 : vector<8x32xf32>
    %109 = vector.broadcast %c2_i32 : i32 to vector<8x1xi32>
    %110 = arith.cmpi slt, %109, %0 : vector<8x1xi32>
    %111 = vector.shape_cast %110 : vector<8x1xi1> to vector<8x1xi1>
    %112 = vector.broadcast %111 : vector<8x1xi1> to vector<8x32xi1>
    %113 = arith.select %112, %108, %87 : vector<8x32xi1>, vector<8x32xf32>
    %c0_47 = arith.constant 0 : index
    %c0_48 = arith.constant 0 : index
    %114 = vector.load %arg7[%c0_47, %c0_48] : memref<8x32xf32, #tpu.memory_space<vmem>>, vector<8x32xf32>
    tpu.vector_store %arg7[%c0_47, %c0_48], %113 {strides = array<i32>} : memref<8x32xf32, #tpu.memory_space<vmem>>, vector<8x32xf32>,
    %115 = vector.shape_cast %110 : vector<8x1xi1> to vector<8x1xi1>
    %116 = vector.broadcast %115 : vector<8x1xi1> to vector<8x32xi1>
    %117 = arith.select %116, %106, %88 : vector<8x32xi1>, vector<8x32xf32>
    %c0_49 = arith.constant 0 : index
    %c0_50 = arith.constant 0 : index
    %118 = vector.load %arg8[%c0_49, %c0_50] : memref<8x32xf32, #tpu.memory_space<vmem>>, vector<8x32xf32>
    tpu.vector_store %arg8[%c0_49, %c0_50], %117 {strides = array<i32>} : memref<8x32xf32, #tpu.memory_space<vmem>>, vector<8x32xf32>,
    %cst_51 = arith.constant 0.000000e+00 : f32
    %119 = vector.shape_cast %110 : vector<8x1xi1> to vector<8x1xi1>
    %120 = vector.broadcast %119 : vector<8x1xi1> to vector<8x32xi1>
    %121 = vector.broadcast %cst_51 : f32 to vector<8x32xf32>
    %122 = arith.select %120, %108, %121 : vector<8x32xi1>, vector<8x32xf32>
    %123 = arith.index_cast %c2_i32 : i32 to index
    %c0_52 = arith.constant 0 : index
    %c0_53 = arith.constant 0 : index
    %124 = vector.load %arg6[%123, %c0_52, %c0_53] : memref<8x8x32xf32, #tpu.memory_space<vmem>>, vector<1x8x32xf32>
    %125 = vector.shape_cast %124 : vector<1x8x32xf32> to vector<8x32xf32>
    %126 = vector.shape_cast %122 : vector<8x32xf32> to vector<1x8x32xf32>
    tpu.vector_store %arg6[%123, %c0_52, %c0_53], %126 {strides = array<i32>} : memref<8x8x32xf32, #tpu.memory_space<vmem>>, vector<1x8x32xf32>,
    %c3_i32 = arith.constant 3 : i32
    %c0_54 = arith.constant 0 : index
    %c0_55 = arith.constant 0 : index
    %127 = vector.load %arg7[%c0_54, %c0_55] : memref<8x32xf32, #tpu.memory_space<vmem>>, vector<8x32xf32>
    %c0_56 = arith.constant 0 : index
    %c0_57 = arith.constant 0 : index
    %128 = vector.load %arg8[%c0_56, %c0_57] : memref<8x32xf32, #tpu.memory_space<vmem>>, vector<8x32xf32>
    %129 = arith.index_cast %c3_i32 : i32 to index
    %c0_58 = arith.constant 0 : index
    %c0_59 = arith.constant 0 : index
    %130 = vector.load %arg1[%129, %c0_58, %c0_59] : memref<8x8x128xf32, #tpu.memory_space<vmem>>, vector<1x8x128xf32>
    %131 = vector.shape_cast %130 : vector<1x8x128xf32> to vector<8x128xf32>
    %cst_60 = arith.constant dense<0.000000e+00> : vector<8x128xf32>
    %132 = tpu.matmul %127, %2, %cst_60 {dimension_numbers = #tpu.dot_dimension_numbers<[1], [0], [0], [1], [0, 0, 1, 1], [], []>} : vector<8x32xf32>, vector<32x128xf32>, vector<8x128xf32> -> vector<8x128xf32>
    %133 = arith.addf %131, %132 : vector<8x128xf32>
    %134 = arith.negf %133 : vector<8x128xf32>
    %135 = math.exp %134 : vector<8x128xf32>
    %cst_61 = arith.constant 1.000000e+00 : f32
    %136 = vector.broadcast %cst_61 : f32 to vector<8x128xf32>
    %137 = arith.addf %136, %135 : vector<8x128xf32>
    %138 = arith.divf %136, %137 : vector<8x128xf32>
    %139 = math.tanh %133 : vector<8x128xf32>
    %140 = vector.extract_strided_slice %138 {offsets = [0, 0], sizes = [8, 32], strides = [1, 1]} : vector<8x128xf32> to vector<8x32xf32>
    %141 = vector.extract_strided_slice %138 {offsets = [0, 32], sizes = [8, 32], strides = [1, 1]} : vector<8x128xf32> to vector<8x32xf32>
    %142 = vector.extract_strided_slice %139 {offsets = [0, 64], sizes = [8, 32], strides = [1, 1]} : vector<8x128xf32> to vector<8x32xf32>
    %143 = vector.extract_strided_slice %138 {offsets = [0, 96], sizes = [8, 32], strides = [1, 1]} : vector<8x128xf32> to vector<8x32xf32>
    %144 = arith.mulf %141, %128 : vector<8x32xf32>
    %145 = arith.mulf %140, %142 : vector<8x32xf32>
    %146 = arith.addf %144, %145 : vector<8x32xf32>
    %147 = math.tanh %146 : vector<8x32xf32>
    %148 = arith.mulf %143, %147 : vector<8x32xf32>
    %149 = vector.broadcast %c3_i32 : i32 to vector<8x1xi32>
    %150 = arith.cmpi slt, %149, %0 : vector<8x1xi32>
    %151 = vector.shape_cast %150 : vector<8x1xi1> to vector<8x1xi1>
    %152 = vector.broadcast %151 : vector<8x1xi1> to vector<8x32xi1>
    %153 = arith.select %152, %148, %127 : vector<8x32xi1>, vector<8x32xf32>
    %c0_62 = arith.constant 0 : index
    %c0_63 = arith.constant 0 : index
    %154 = vector.load %arg7[%c0_62, %c0_63] : memref<8x32xf32, #tpu.memory_space<vmem>>, vector<8x32xf32>
    tpu.vector_store %arg7[%c0_62, %c0_63], %153 {strides = array<i32>} : memref<8x32xf32, #tpu.memory_space<vmem>>, vector<8x32xf32>,
    %155 = vector.shape_cast %150 : vector<8x1xi1> to vector<8x1xi1>
    %156 = vector.broadcast %155 : vector<8x1xi1> to vector<8x32xi1>
    %157 = arith.select %156, %146, %128 : vector<8x32xi1>, vector<8x32xf32>
    %c0_64 = arith.constant 0 : index
    %c0_65 = arith.constant 0 : index
    %158 = vector.load %arg8[%c0_64, %c0_65] : memref<8x32xf32, #tpu.memory_space<vmem>>, vector<8x32xf32>
    tpu.vector_store %arg8[%c0_64, %c0_65], %157 {strides = array<i32>} : memref<8x32xf32, #tpu.memory_space<vmem>>, vector<8x32xf32>,
    %cst_66 = arith.constant 0.000000e+00 : f32
    %159 = vector.shape_cast %150 : vector<8x1xi1> to vector<8x1xi1>
    %160 = vector.broadcast %159 : vector<8x1xi1> to vector<8x32xi1>
    %161 = vector.broadcast %cst_66 : f32 to vector<8x32xf32>
    %162 = arith.select %160, %148, %161 : vector<8x32xi1>, vector<8x32xf32>
    %163 = arith.index_cast %c3_i32 : i32 to index
    %c0_67 = arith.constant 0 : index
    %c0_68 = arith.constant 0 : index
    %164 = vector.load %arg6[%163, %c0_67, %c0_68] : memref<8x8x32xf32, #tpu.memory_space<vmem>>, vector<1x8x32xf32>
    %165 = vector.shape_cast %164 : vector<1x8x32xf32> to vector<8x32xf32>
    %166 = vector.shape_cast %162 : vector<8x32xf32> to vector<1x8x32xf32>
    tpu.vector_store %arg6[%163, %c0_67, %c0_68], %166 {strides = array<i32>} : memref<8x8x32xf32, #tpu.memory_space<vmem>>, vector<1x8x32xf32>,
    %c4_i32 = arith.constant 4 : i32
    %c0_69 = arith.constant 0 : index
    %c0_70 = arith.constant 0 : index
    %167 = vector.load %arg7[%c0_69, %c0_70] : memref<8x32xf32, #tpu.memory_space<vmem>>, vector<8x32xf32>
    %c0_71 = arith.constant 0 : index
    %c0_72 = arith.constant 0 : index
    %168 = vector.load %arg8[%c0_71, %c0_72] : memref<8x32xf32, #tpu.memory_space<vmem>>, vector<8x32xf32>
    %169 = arith.index_cast %c4_i32 : i32 to index
    %c0_73 = arith.constant 0 : index
    %c0_74 = arith.constant 0 : index
    %170 = vector.load %arg1[%169, %c0_73, %c0_74] : memref<8x8x128xf32, #tpu.memory_space<vmem>>, vector<1x8x128xf32>
    %171 = vector.shape_cast %170 : vector<1x8x128xf32> to vector<8x128xf32>
    %cst_75 = arith.constant dense<0.000000e+00> : vector<8x128xf32>
    %172 = tpu.matmul %167, %2, %cst_75 {dimension_numbers = #tpu.dot_dimension_numbers<[1], [0], [0], [1], [0, 0, 1, 1], [], []>} : vector<8x32xf32>, vector<32x128xf32>, vector<8x128xf32> -> vector<8x128xf32>
    %173 = arith.addf %171, %172 : vector<8x128xf32>
    %174 = arith.negf %173 : vector<8x128xf32>
    %175 = math.exp %174 : vector<8x128xf32>
    %cst_76 = arith.constant 1.000000e+00 : f32
    %176 = vector.broadcast %cst_76 : f32 to vector<8x128xf32>
    %177 = arith.addf %176, %175 : vector<8x128xf32>
    %178 = arith.divf %176, %177 : vector<8x128xf32>
    %179 = math.tanh %173 : vector<8x128xf32>
    %180 = vector.extract_strided_slice %178 {offsets = [0, 0], sizes = [8, 32], strides = [1, 1]} : vector<8x128xf32> to vector<8x32xf32>
    %181 = vector.extract_strided_slice %178 {offsets = [0, 32], sizes = [8, 32], strides = [1, 1]} : vector<8x128xf32> to vector<8x32xf32>
    %182 = vector.extract_strided_slice %179 {offsets = [0, 64], sizes = [8, 32], strides = [1, 1]} : vector<8x128xf32> to vector<8x32xf32>
    %183 = vector.extract_strided_slice %178 {offsets = [0, 96], sizes = [8, 32], strides = [1, 1]} : vector<8x128xf32> to vector<8x32xf32>
    %184 = arith.mulf %181, %168 : vector<8x32xf32>
    %185 = arith.mulf %180, %182 : vector<8x32xf32>
    %186 = arith.addf %184, %185 : vector<8x32xf32>
    %187 = math.tanh %186 : vector<8x32xf32>
    %188 = arith.mulf %183, %187 : vector<8x32xf32>
    %189 = vector.broadcast %c4_i32 : i32 to vector<8x1xi32>
    %190 = arith.cmpi slt, %189, %0 : vector<8x1xi32>
    %191 = vector.shape_cast %190 : vector<8x1xi1> to vector<8x1xi1>
    %192 = vector.broadcast %191 : vector<8x1xi1> to vector<8x32xi1>
    %193 = arith.select %192, %188, %167 : vector<8x32xi1>, vector<8x32xf32>
    %c0_77 = arith.constant 0 : index
    %c0_78 = arith.constant 0 : index
    %194 = vector.load %arg7[%c0_77, %c0_78] : memref<8x32xf32, #tpu.memory_space<vmem>>, vector<8x32xf32>
    tpu.vector_store %arg7[%c0_77, %c0_78], %193 {strides = array<i32>} : memref<8x32xf32, #tpu.memory_space<vmem>>, vector<8x32xf32>,
    %195 = vector.shape_cast %190 : vector<8x1xi1> to vector<8x1xi1>
    %196 = vector.broadcast %195 : vector<8x1xi1> to vector<8x32xi1>
    %197 = arith.select %196, %186, %168 : vector<8x32xi1>, vector<8x32xf32>
    %c0_79 = arith.constant 0 : index
    %c0_80 = arith.constant 0 : index
    %198 = vector.load %arg8[%c0_79, %c0_80] : memref<8x32xf32, #tpu.memory_space<vmem>>, vector<8x32xf32>
    tpu.vector_store %arg8[%c0_79, %c0_80], %197 {strides = array<i32>} : memref<8x32xf32, #tpu.memory_space<vmem>>, vector<8x32xf32>,
    %cst_81 = arith.constant 0.000000e+00 : f32
    %199 = vector.shape_cast %190 : vector<8x1xi1> to vector<8x1xi1>
    %200 = vector.broadcast %199 : vector<8x1xi1> to vector<8x32xi1>
    %201 = vector.broadcast %cst_81 : f32 to vector<8x32xf32>
    %202 = arith.select %200, %188, %201 : vector<8x32xi1>, vector<8x32xf32>
    %203 = arith.index_cast %c4_i32 : i32 to index
    %c0_82 = arith.constant 0 : index
    %c0_83 = arith.constant 0 : index
    %204 = vector.load %arg6[%203, %c0_82, %c0_83] : memref<8x8x32xf32, #tpu.memory_space<vmem>>, vector<1x8x32xf32>
    %205 = vector.shape_cast %204 : vector<1x8x32xf32> to vector<8x32xf32>
    %206 = vector.shape_cast %202 : vector<8x32xf32> to vector<1x8x32xf32>
    tpu.vector_store %arg6[%203, %c0_82, %c0_83], %206 {strides = array<i32>} : memref<8x8x32xf32, #tpu.memory_space<vmem>>, vector<1x8x32xf32>,
    %c5_i32 = arith.constant 5 : i32
    %c0_84 = arith.constant 0 : index
    %c0_85 = arith.constant 0 : index
    %207 = vector.load %arg7[%c0_84, %c0_85] : memref<8x32xf32, #tpu.memory_space<vmem>>, vector<8x32xf32>
    %c0_86 = arith.constant 0 : index
    %c0_87 = arith.constant 0 : index
    %208 = vector.load %arg8[%c0_86, %c0_87] : memref<8x32xf32, #tpu.memory_space<vmem>>, vector<8x32xf32>
    %209 = arith.index_cast %c5_i32 : i32 to index
    %c0_88 = arith.constant 0 : index
    %c0_89 = arith.constant 0 : index
    %210 = vector.load %arg1[%209, %c0_88, %c0_89] : memref<8x8x128xf32, #tpu.memory_space<vmem>>, vector<1x8x128xf32>
    %211 = vector.shape_cast %210 : vector<1x8x128xf32> to vector<8x128xf32>
    %cst_90 = arith.constant dense<0.000000e+00> : vector<8x128xf32>
    %212 = tpu.matmul %207, %2, %cst_90 {dimension_numbers = #tpu.dot_dimension_numbers<[1], [0], [0], [1], [0, 0, 1, 1], [], []>} : vector<8x32xf32>, vector<32x128xf32>, vector<8x128xf32> -> vector<8x128xf32>
    %213 = arith.addf %211, %212 : vector<8x128xf32>
    %214 = arith.negf %213 : vector<8x128xf32>
    %215 = math.exp %214 : vector<8x128xf32>
    %cst_91 = arith.constant 1.000000e+00 : f32
    %216 = vector.broadcast %cst_91 : f32 to vector<8x128xf32>
    %217 = arith.addf %216, %215 : vector<8x128xf32>
    %218 = arith.divf %216, %217 : vector<8x128xf32>
    %219 = math.tanh %213 : vector<8x128xf32>
    %220 = vector.extract_strided_slice %218 {offsets = [0, 0], sizes = [8, 32], strides = [1, 1]} : vector<8x128xf32> to vector<8x32xf32>
    %221 = vector.extract_strided_slice %218 {offsets = [0, 32], sizes = [8, 32], strides = [1, 1]} : vector<8x128xf32> to vector<8x32xf32>
    %222 = vector.extract_strided_slice %219 {offsets = [0, 64], sizes = [8, 32], strides = [1, 1]} : vector<8x128xf32> to vector<8x32xf32>
    %223 = vector.extract_strided_slice %218 {offsets = [0, 96], sizes = [8, 32], strides = [1, 1]} : vector<8x128xf32> to vector<8x32xf32>
    %224 = arith.mulf %221, %208 : vector<8x32xf32>
    %225 = arith.mulf %220, %222 : vector<8x32xf32>
    %226 = arith.addf %224, %225 : vector<8x32xf32>
    %227 = math.tanh %226 : vector<8x32xf32>
    %228 = arith.mulf %223, %227 : vector<8x32xf32>
    %229 = vector.broadcast %c5_i32 : i32 to vector<8x1xi32>
    %230 = arith.cmpi slt, %229, %0 : vector<8x1xi32>
    %231 = vector.shape_cast %230 : vector<8x1xi1> to vector<8x1xi1>
    %232 = vector.broadcast %231 : vector<8x1xi1> to vector<8x32xi1>
    %233 = arith.select %232, %228, %207 : vector<8x32xi1>, vector<8x32xf32>
    %c0_92 = arith.constant 0 : index
    %c0_93 = arith.constant 0 : index
    %234 = vector.load %arg7[%c0_92, %c0_93] : memref<8x32xf32, #tpu.memory_space<vmem>>, vector<8x32xf32>
    tpu.vector_store %arg7[%c0_92, %c0_93], %233 {strides = array<i32>} : memref<8x32xf32, #tpu.memory_space<vmem>>, vector<8x32xf32>,
    %235 = vector.shape_cast %230 : vector<8x1xi1> to vector<8x1xi1>
    %236 = vector.broadcast %235 : vector<8x1xi1> to vector<8x32xi1>
    %237 = arith.select %236, %226, %208 : vector<8x32xi1>, vector<8x32xf32>
    %c0_94 = arith.constant 0 : index
    %c0_95 = arith.constant 0 : index
    %238 = vector.load %arg8[%c0_94, %c0_95] : memref<8x32xf32, #tpu.memory_space<vmem>>, vector<8x32xf32>
    tpu.vector_store %arg8[%c0_94, %c0_95], %237 {strides = array<i32>} : memref<8x32xf32, #tpu.memory_space<vmem>>, vector<8x32xf32>,
    %cst_96 = arith.constant 0.000000e+00 : f32
    %239 = vector.shape_cast %230 : vector<8x1xi1> to vector<8x1xi1>
    %240 = vector.broadcast %239 : vector<8x1xi1> to vector<8x32xi1>
    %241 = vector.broadcast %cst_96 : f32 to vector<8x32xf32>
    %242 = arith.select %240, %228, %241 : vector<8x32xi1>, vector<8x32xf32>
    %243 = arith.index_cast %c5_i32 : i32 to index
    %c0_97 = arith.constant 0 : index
    %c0_98 = arith.constant 0 : index
    %244 = vector.load %arg6[%243, %c0_97, %c0_98] : memref<8x8x32xf32, #tpu.memory_space<vmem>>, vector<1x8x32xf32>
    %245 = vector.shape_cast %244 : vector<1x8x32xf32> to vector<8x32xf32>
    %246 = vector.shape_cast %242 : vector<8x32xf32> to vector<1x8x32xf32>
    tpu.vector_store %arg6[%243, %c0_97, %c0_98], %246 {strides = array<i32>} : memref<8x8x32xf32, #tpu.memory_space<vmem>>, vector<1x8x32xf32>,
    %c6_i32 = arith.constant 6 : i32
    %c0_99 = arith.constant 0 : index
    %c0_100 = arith.constant 0 : index
    %247 = vector.load %arg7[%c0_99, %c0_100] : memref<8x32xf32, #tpu.memory_space<vmem>>, vector<8x32xf32>
    %c0_101 = arith.constant 0 : index
    %c0_102 = arith.constant 0 : index
    %248 = vector.load %arg8[%c0_101, %c0_102] : memref<8x32xf32, #tpu.memory_space<vmem>>, vector<8x32xf32>
    %249 = arith.index_cast %c6_i32 : i32 to index
    %c0_103 = arith.constant 0 : index
    %c0_104 = arith.constant 0 : index
    %250 = vector.load %arg1[%249, %c0_103, %c0_104] : memref<8x8x128xf32, #tpu.memory_space<vmem>>, vector<1x8x128xf32>
    %251 = vector.shape_cast %250 : vector<1x8x128xf32> to vector<8x128xf32>
    %cst_105 = arith.constant dense<0.000000e+00> : vector<8x128xf32>
    %252 = tpu.matmul %247, %2, %cst_105 {dimension_numbers = #tpu.dot_dimension_numbers<[1], [0], [0], [1], [0, 0, 1, 1], [], []>} : vector<8x32xf32>, vector<32x128xf32>, vector<8x128xf32> -> vector<8x128xf32>
    %253 = arith.addf %251, %252 : vector<8x128xf32>
    %254 = arith.negf %253 : vector<8x128xf32>
    %255 = math.exp %254 : vector<8x128xf32>
    %cst_106 = arith.constant 1.000000e+00 : f32
    %256 = vector.broadcast %cst_106 : f32 to vector<8x128xf32>
    %257 = arith.addf %256, %255 : vector<8x128xf32>
    %258 = arith.divf %256, %257 : vector<8x128xf32>
    %259 = math.tanh %253 : vector<8x128xf32>
    %260 = vector.extract_strided_slice %258 {offsets = [0, 0], sizes = [8, 32], strides = [1, 1]} : vector<8x128xf32> to vector<8x32xf32>
    %261 = vector.extract_strided_slice %258 {offsets = [0, 32], sizes = [8, 32], strides = [1, 1]} : vector<8x128xf32> to vector<8x32xf32>
    %262 = vector.extract_strided_slice %259 {offsets = [0, 64], sizes = [8, 32], strides = [1, 1]} : vector<8x128xf32> to vector<8x32xf32>
    %263 = vector.extract_strided_slice %258 {offsets = [0, 96], sizes = [8, 32], strides = [1, 1]} : vector<8x128xf32> to vector<8x32xf32>
    %264 = arith.mulf %261, %248 : vector<8x32xf32>
    %265 = arith.mulf %260, %262 : vector<8x32xf32>
    %266 = arith.addf %264, %265 : vector<8x32xf32>
    %267 = math.tanh %266 : vector<8x32xf32>
    %268 = arith.mulf %263, %267 : vector<8x32xf32>
    %269 = vector.broadcast %c6_i32 : i32 to vector<8x1xi32>
    %270 = arith.cmpi slt, %269, %0 : vector<8x1xi32>
    %271 = vector.shape_cast %270 : vector<8x1xi1> to vector<8x1xi1>
    %272 = vector.broadcast %271 : vector<8x1xi1> to vector<8x32xi1>
    %273 = arith.select %272, %268, %247 : vector<8x32xi1>, vector<8x32xf32>
    %c0_107 = arith.constant 0 : index
    %c0_108 = arith.constant 0 : index
    %274 = vector.load %arg7[%c0_107, %c0_108] : memref<8x32xf32, #tpu.memory_space<vmem>>, vector<8x32xf32>
    tpu.vector_store %arg7[%c0_107, %c0_108], %273 {strides = array<i32>} : memref<8x32xf32, #tpu.memory_space<vmem>>, vector<8x32xf32>,
    %275 = vector.shape_cast %270 : vector<8x1xi1> to vector<8x1xi1>
    %276 = vector.broadcast %275 : vector<8x1xi1> to vector<8x32xi1>
    %277 = arith.select %276, %266, %248 : vector<8x32xi1>, vector<8x32xf32>
    %c0_109 = arith.constant 0 : index
    %c0_110 = arith.constant 0 : index
    %278 = vector.load %arg8[%c0_109, %c0_110] : memref<8x32xf32, #tpu.memory_space<vmem>>, vector<8x32xf32>
    tpu.vector_store %arg8[%c0_109, %c0_110], %277 {strides = array<i32>} : memref<8x32xf32, #tpu.memory_space<vmem>>, vector<8x32xf32>,
    %cst_111 = arith.constant 0.000000e+00 : f32
    %279 = vector.shape_cast %270 : vector<8x1xi1> to vector<8x1xi1>
    %280 = vector.broadcast %279 : vector<8x1xi1> to vector<8x32xi1>
    %281 = vector.broadcast %cst_111 : f32 to vector<8x32xf32>
    %282 = arith.select %280, %268, %281 : vector<8x32xi1>, vector<8x32xf32>
    %283 = arith.index_cast %c6_i32 : i32 to index
    %c0_112 = arith.constant 0 : index
    %c0_113 = arith.constant 0 : index
    %284 = vector.load %arg6[%283, %c0_112, %c0_113] : memref<8x8x32xf32, #tpu.memory_space<vmem>>, vector<1x8x32xf32>
    %285 = vector.shape_cast %284 : vector<1x8x32xf32> to vector<8x32xf32>
    %286 = vector.shape_cast %282 : vector<8x32xf32> to vector<1x8x32xf32>
    tpu.vector_store %arg6[%283, %c0_112, %c0_113], %286 {strides = array<i32>} : memref<8x8x32xf32, #tpu.memory_space<vmem>>, vector<1x8x32xf32>,
    %c7_i32 = arith.constant 7 : i32
    %c0_114 = arith.constant 0 : index
    %c0_115 = arith.constant 0 : index
    %287 = vector.load %arg7[%c0_114, %c0_115] : memref<8x32xf32, #tpu.memory_space<vmem>>, vector<8x32xf32>
    %c0_116 = arith.constant 0 : index
    %c0_117 = arith.constant 0 : index
    %288 = vector.load %arg8[%c0_116, %c0_117] : memref<8x32xf32, #tpu.memory_space<vmem>>, vector<8x32xf32>
    %289 = arith.index_cast %c7_i32 : i32 to index
    %c0_118 = arith.constant 0 : index
    %c0_119 = arith.constant 0 : index
    %290 = vector.load %arg1[%289, %c0_118, %c0_119] : memref<8x8x128xf32, #tpu.memory_space<vmem>>, vector<1x8x128xf32>
    %291 = vector.shape_cast %290 : vector<1x8x128xf32> to vector<8x128xf32>
    %cst_120 = arith.constant dense<0.000000e+00> : vector<8x128xf32>
    %292 = tpu.matmul %287, %2, %cst_120 {dimension_numbers = #tpu.dot_dimension_numbers<[1], [0], [0], [1], [0, 0, 1, 1], [], []>} : vector<8x32xf32>, vector<32x128xf32>, vector<8x128xf32> -> vector<8x128xf32>
    %293 = arith.addf %291, %292 : vector<8x128xf32>
    %294 = arith.negf %293 : vector<8x128xf32>
    %295 = math.exp %294 : vector<8x128xf32>
    %cst_121 = arith.constant 1.000000e+00 : f32
    %296 = vector.broadcast %cst_121 : f32 to vector<8x128xf32>
    %297 = arith.addf %296, %295 : vector<8x128xf32>
    %298 = arith.divf %296, %297 : vector<8x128xf32>
    %299 = math.tanh %293 : vector<8x128xf32>
    %300 = vector.extract_strided_slice %298 {offsets = [0, 0], sizes = [8, 32], strides = [1, 1]} : vector<8x128xf32> to vector<8x32xf32>
    %301 = vector.extract_strided_slice %298 {offsets = [0, 32], sizes = [8, 32], strides = [1, 1]} : vector<8x128xf32> to vector<8x32xf32>
    %302 = vector.extract_strided_slice %299 {offsets = [0, 64], sizes = [8, 32], strides = [1, 1]} : vector<8x128xf32> to vector<8x32xf32>
    %303 = vector.extract_strided_slice %298 {offsets = [0, 96], sizes = [8, 32], strides = [1, 1]} : vector<8x128xf32> to vector<8x32xf32>
    %304 = arith.mulf %301, %288 : vector<8x32xf32>
    %305 = arith.mulf %300, %302 : vector<8x32xf32>
    %306 = arith.addf %304, %305 : vector<8x32xf32>
    %307 = math.tanh %306 : vector<8x32xf32>
    %308 = arith.mulf %303, %307 : vector<8x32xf32>
    %309 = vector.broadcast %c7_i32 : i32 to vector<8x1xi32>
    %310 = arith.cmpi slt, %309, %0 : vector<8x1xi32>
    %311 = vector.shape_cast %310 : vector<8x1xi1> to vector<8x1xi1>
    %312 = vector.broadcast %311 : vector<8x1xi1> to vector<8x32xi1>
    %313 = arith.select %312, %308, %287 : vector<8x32xi1>, vector<8x32xf32>
    %c0_122 = arith.constant 0 : index
    %c0_123 = arith.constant 0 : index
    %314 = vector.load %arg7[%c0_122, %c0_123] : memref<8x32xf32, #tpu.memory_space<vmem>>, vector<8x32xf32>
    tpu.vector_store %arg7[%c0_122, %c0_123], %313 {strides = array<i32>} : memref<8x32xf32, #tpu.memory_space<vmem>>, vector<8x32xf32>,
    %315 = vector.shape_cast %310 : vector<8x1xi1> to vector<8x1xi1>
    %316 = vector.broadcast %315 : vector<8x1xi1> to vector<8x32xi1>
    %317 = arith.select %316, %306, %288 : vector<8x32xi1>, vector<8x32xf32>
    %c0_124 = arith.constant 0 : index
    %c0_125 = arith.constant 0 : index
    %318 = vector.load %arg8[%c0_124, %c0_125] : memref<8x32xf32, #tpu.memory_space<vmem>>, vector<8x32xf32>
    tpu.vector_store %arg8[%c0_124, %c0_125], %317 {strides = array<i32>} : memref<8x32xf32, #tpu.memory_space<vmem>>, vector<8x32xf32>,
    %cst_126 = arith.constant 0.000000e+00 : f32
    %319 = vector.shape_cast %310 : vector<8x1xi1> to vector<8x1xi1>
    %320 = vector.broadcast %319 : vector<8x1xi1> to vector<8x32xi1>
    %321 = vector.broadcast %cst_126 : f32 to vector<8x32xf32>
    %322 = arith.select %320, %308, %321 : vector<8x32xi1>, vector<8x32xf32>
    %323 = arith.index_cast %c7_i32 : i32 to index
    %c0_127 = arith.constant 0 : index
    %c0_128 = arith.constant 0 : index
    %324 = vector.load %arg6[%323, %c0_127, %c0_128] : memref<8x8x32xf32, #tpu.memory_space<vmem>>, vector<1x8x32xf32>
    %325 = vector.shape_cast %324 : vector<1x8x32xf32> to vector<8x32xf32>
    %326 = vector.shape_cast %322 : vector<8x32xf32> to vector<1x8x32xf32>
    tpu.vector_store %arg6[%323, %c0_127, %c0_128], %326 {strides = array<i32>} : memref<8x8x32xf32, #tpu.memory_space<vmem>>, vector<1x8x32xf32>,
    %c8_i32 = arith.constant 8 : i32
    %c0_129 = arith.constant 0 : index
    %c0_130 = arith.constant 0 : index
    %c0_131 = arith.constant 0 : index
    %327 = vector.load %arg6[%c0_129, %c0_130, %c0_131] : memref<8x8x32xf32, #tpu.memory_space<vmem>>, vector<8x8x32xf32>
    %328 = vector.shape_cast %327 : vector<8x8x32xf32> to vector<64x32xf32>
    %c0_132 = arith.constant 0 : index
    %c0_133 = arith.constant 0 : index
    %c0_134 = arith.constant 0 : index
    %329 = vector.load %arg3[%c0_132, %c0_133, %c0_134] : memref<1x32x128xf32, #tpu.memory_space<vmem>>, vector<1x32x128xf32>
    %330 = vector.shape_cast %329 : vector<1x32x128xf32> to vector<32x128xf32>
    %cst_135 = arith.constant dense<0.000000e+00> : vector<64x128xf32>
    %331 = tpu.matmul %328, %330, %cst_135 {dimension_numbers = #tpu.dot_dimension_numbers<[1], [0], [0], [1], [0, 0, 1, 1], [], []>} : vector<64x32xf32>, vector<32x128xf32>, vector<64x128xf32> -> vector<64x128xf32>
    %332 = vector.shape_cast %331 : vector<64x128xf32> to vector<8x8x128xf32>
    %c1 = arith.constant 1 : index
    %c0_136 = arith.constant 0 : index
    %c0_137 = arith.constant 0 : index
    %333 = vector.load %arg5[%c1, %c0_136, %c0_137] : memref<2x1x128xf32, #tpu.memory_space<vmem>>, vector<1x1x128xf32>
    %334 = vector.shape_cast %333 : vector<1x1x128xf32> to vector<1x128xf32>
    %335 = vector.shape_cast %334 : vector<1x128xf32> to vector<1x1x128xf32>
    %336 = vector.broadcast %335 : vector<1x1x128xf32> to vector<8x8x128xf32>
    %337 = arith.addf %332, %336 : vector<8x8x128xf32>
    %c0_138 = arith.constant 0 : index
    %c0_139 = arith.constant 0 : index
    %c0_140 = arith.constant 0 : index
    %338 = vector.load %arg9[%c0_138, %c0_139, %c0_140] : memref<8x8x128xf32, #tpu.memory_space<vmem>>, vector<8x8x128xf32>
    tpu.vector_store %arg9[%c0_138, %c0_139, %c0_140], %337 {strides = array<i32>} : memref<8x8x128xf32, #tpu.memory_space<vmem>>, vector<8x8x128xf32>,
    %c1_141 = arith.constant 1 : index
    %c0_142 = arith.constant 0 : index
    %c0_143 = arith.constant 0 : index
    %339 = vector.load %arg4[%c1_141, %c0_142, %c0_143] : memref<2x32x128xf32, #tpu.memory_space<vmem>>, vector<1x32x128xf32>
    %340 = vector.shape_cast %339 : vector<1x32x128xf32> to vector<32x128xf32>
    %cst_144 = arith.constant 0.000000e+00 : f32
    %341 = vector.broadcast %cst_144 : f32 to vector<8x32xf32>
    %c0_145 = arith.constant 0 : index
    %c0_146 = arith.constant 0 : index
    %342 = vector.load %arg7[%c0_145, %c0_146] : memref<8x32xf32, #tpu.memory_space<vmem>>, vector<8x32xf32>
    tpu.vector_store %arg7[%c0_145, %c0_146], %341 {strides = array<i32>} : memref<8x32xf32, #tpu.memory_space<vmem>>, vector<8x32xf32>,
    %cst_147 = arith.constant 0.000000e+00 : f32
    %343 = vector.broadcast %cst_147 : f32 to vector<8x32xf32>
    %c0_148 = arith.constant 0 : index
    %c0_149 = arith.constant 0 : index
    %344 = vector.load %arg8[%c0_148, %c0_149] : memref<8x32xf32, #tpu.memory_space<vmem>>, vector<8x32xf32>
    tpu.vector_store %arg8[%c0_148, %c0_149], %343 {strides = array<i32>} : memref<8x32xf32, #tpu.memory_space<vmem>>, vector<8x32xf32>,
    %c0_i32_150 = arith.constant 0 : i32
    %c0_151 = arith.constant 0 : index
    %c0_152 = arith.constant 0 : index
    %345 = vector.load %arg7[%c0_151, %c0_152] : memref<8x32xf32, #tpu.memory_space<vmem>>, vector<8x32xf32>
    %c0_153 = arith.constant 0 : index
    %c0_154 = arith.constant 0 : index
    %346 = vector.load %arg8[%c0_153, %c0_154] : memref<8x32xf32, #tpu.memory_space<vmem>>, vector<8x32xf32>
    %347 = arith.index_cast %c0_i32_150 : i32 to index
    %c0_155 = arith.constant 0 : index
    %c0_156 = arith.constant 0 : index
    %348 = vector.load %arg9[%347, %c0_155, %c0_156] : memref<8x8x128xf32, #tpu.memory_space<vmem>>, vector<1x8x128xf32>
    %349 = vector.shape_cast %348 : vector<1x8x128xf32> to vector<8x128xf32>
    %cst_157 = arith.constant dense<0.000000e+00> : vector<8x128xf32>
    %350 = tpu.matmul %345, %340, %cst_157 {dimension_numbers = #tpu.dot_dimension_numbers<[1], [0], [0], [1], [0, 0, 1, 1], [], []>} : vector<8x32xf32>, vector<32x128xf32>, vector<8x128xf32> -> vector<8x128xf32>
    %351 = arith.addf %349, %350 : vector<8x128xf32>
    %352 = arith.negf %351 : vector<8x128xf32>
    %353 = math.exp %352 : vector<8x128xf32>
    %cst_158 = arith.constant 1.000000e+00 : f32
    %354 = vector.broadcast %cst_158 : f32 to vector<8x128xf32>
    %355 = arith.addf %354, %353 : vector<8x128xf32>
    %356 = arith.divf %354, %355 : vector<8x128xf32>
    %357 = math.tanh %351 : vector<8x128xf32>
    %358 = vector.extract_strided_slice %356 {offsets = [0, 0], sizes = [8, 32], strides = [1, 1]} : vector<8x128xf32> to vector<8x32xf32>
    %359 = vector.extract_strided_slice %356 {offsets = [0, 32], sizes = [8, 32], strides = [1, 1]} : vector<8x128xf32> to vector<8x32xf32>
    %360 = vector.extract_strided_slice %357 {offsets = [0, 64], sizes = [8, 32], strides = [1, 1]} : vector<8x128xf32> to vector<8x32xf32>
    %361 = vector.extract_strided_slice %356 {offsets = [0, 96], sizes = [8, 32], strides = [1, 1]} : vector<8x128xf32> to vector<8x32xf32>
    %362 = arith.mulf %359, %346 : vector<8x32xf32>
    %363 = arith.mulf %358, %360 : vector<8x32xf32>
    %364 = arith.addf %362, %363 : vector<8x32xf32>
    %365 = math.tanh %364 : vector<8x32xf32>
    %366 = arith.mulf %361, %365 : vector<8x32xf32>
    %367 = vector.broadcast %c0_i32_150 : i32 to vector<8x1xi32>
    %368 = arith.cmpi slt, %367, %0 : vector<8x1xi32>
    %369 = vector.shape_cast %368 : vector<8x1xi1> to vector<8x1xi1>
    %370 = vector.broadcast %369 : vector<8x1xi1> to vector<8x32xi1>
    %371 = arith.select %370, %366, %345 : vector<8x32xi1>, vector<8x32xf32>
    %c0_159 = arith.constant 0 : index
    %c0_160 = arith.constant 0 : index
    %372 = vector.load %arg7[%c0_159, %c0_160] : memref<8x32xf32, #tpu.memory_space<vmem>>, vector<8x32xf32>
    tpu.vector_store %arg7[%c0_159, %c0_160], %371 {strides = array<i32>} : memref<8x32xf32, #tpu.memory_space<vmem>>, vector<8x32xf32>,
    %373 = vector.shape_cast %368 : vector<8x1xi1> to vector<8x1xi1>
    %374 = vector.broadcast %373 : vector<8x1xi1> to vector<8x32xi1>
    %375 = arith.select %374, %364, %346 : vector<8x32xi1>, vector<8x32xf32>
    %c0_161 = arith.constant 0 : index
    %c0_162 = arith.constant 0 : index
    %376 = vector.load %arg8[%c0_161, %c0_162] : memref<8x32xf32, #tpu.memory_space<vmem>>, vector<8x32xf32>
    tpu.vector_store %arg8[%c0_161, %c0_162], %375 {strides = array<i32>} : memref<8x32xf32, #tpu.memory_space<vmem>>, vector<8x32xf32>,
    %cst_163 = arith.constant 0.000000e+00 : f32
    %377 = vector.shape_cast %368 : vector<8x1xi1> to vector<8x1xi1>
    %378 = vector.broadcast %377 : vector<8x1xi1> to vector<8x32xi1>
    %379 = vector.broadcast %cst_163 : f32 to vector<8x32xf32>
    %380 = arith.select %378, %366, %379 : vector<8x32xi1>, vector<8x32xf32>
    %381 = arith.index_cast %c0_i32_150 : i32 to index
    %c0_164 = arith.constant 0 : index
    %c0_165 = arith.constant 0 : index
    %382 = vector.load %arg6[%381, %c0_164, %c0_165] : memref<8x8x32xf32, #tpu.memory_space<vmem>>, vector<1x8x32xf32>
    %383 = vector.shape_cast %382 : vector<1x8x32xf32> to vector<8x32xf32>
    %384 = vector.shape_cast %380 : vector<8x32xf32> to vector<1x8x32xf32>
    tpu.vector_store %arg6[%381, %c0_164, %c0_165], %384 {strides = array<i32>} : memref<8x8x32xf32, #tpu.memory_space<vmem>>, vector<1x8x32xf32>,
    %c1_i32_166 = arith.constant 1 : i32
    %c0_167 = arith.constant 0 : index
    %c0_168 = arith.constant 0 : index
    %385 = vector.load %arg7[%c0_167, %c0_168] : memref<8x32xf32, #tpu.memory_space<vmem>>, vector<8x32xf32>
    %c0_169 = arith.constant 0 : index
    %c0_170 = arith.constant 0 : index
    %386 = vector.load %arg8[%c0_169, %c0_170] : memref<8x32xf32, #tpu.memory_space<vmem>>, vector<8x32xf32>
    %387 = arith.index_cast %c1_i32_166 : i32 to index
    %c0_171 = arith.constant 0 : index
    %c0_172 = arith.constant 0 : index
    %388 = vector.load %arg9[%387, %c0_171, %c0_172] : memref<8x8x128xf32, #tpu.memory_space<vmem>>, vector<1x8x128xf32>
    %389 = vector.shape_cast %388 : vector<1x8x128xf32> to vector<8x128xf32>
    %cst_173 = arith.constant dense<0.000000e+00> : vector<8x128xf32>
    %390 = tpu.matmul %385, %340, %cst_173 {dimension_numbers = #tpu.dot_dimension_numbers<[1], [0], [0], [1], [0, 0, 1, 1], [], []>} : vector<8x32xf32>, vector<32x128xf32>, vector<8x128xf32> -> vector<8x128xf32>
    %391 = arith.addf %389, %390 : vector<8x128xf32>
    %392 = arith.negf %391 : vector<8x128xf32>
    %393 = math.exp %392 : vector<8x128xf32>
    %cst_174 = arith.constant 1.000000e+00 : f32
    %394 = vector.broadcast %cst_174 : f32 to vector<8x128xf32>
    %395 = arith.addf %394, %393 : vector<8x128xf32>
    %396 = arith.divf %394, %395 : vector<8x128xf32>
    %397 = math.tanh %391 : vector<8x128xf32>
    %398 = vector.extract_strided_slice %396 {offsets = [0, 0], sizes = [8, 32], strides = [1, 1]} : vector<8x128xf32> to vector<8x32xf32>
    %399 = vector.extract_strided_slice %396 {offsets = [0, 32], sizes = [8, 32], strides = [1, 1]} : vector<8x128xf32> to vector<8x32xf32>
    %400 = vector.extract_strided_slice %397 {offsets = [0, 64], sizes = [8, 32], strides = [1, 1]} : vector<8x128xf32> to vector<8x32xf32>
    %401 = vector.extract_strided_slice %396 {offsets = [0, 96], sizes = [8, 32], strides = [1, 1]} : vector<8x128xf32> to vector<8x32xf32>
    %402 = arith.mulf %399, %386 : vector<8x32xf32>
    %403 = arith.mulf %398, %400 : vector<8x32xf32>
    %404 = arith.addf %402, %403 : vector<8x32xf32>
    %405 = math.tanh %404 : vector<8x32xf32>
    %406 = arith.mulf %401, %405 : vector<8x32xf32>
    %407 = vector.broadcast %c1_i32_166 : i32 to vector<8x1xi32>
    %408 = arith.cmpi slt, %407, %0 : vector<8x1xi32>
    %409 = vector.shape_cast %408 : vector<8x1xi1> to vector<8x1xi1>
    %410 = vector.broadcast %409 : vector<8x1xi1> to vector<8x32xi1>
    %411 = arith.select %410, %406, %385 : vector<8x32xi1>, vector<8x32xf32>
    %c0_175 = arith.constant 0 : index
    %c0_176 = arith.constant 0 : index
    %412 = vector.load %arg7[%c0_175, %c0_176] : memref<8x32xf32, #tpu.memory_space<vmem>>, vector<8x32xf32>
    tpu.vector_store %arg7[%c0_175, %c0_176], %411 {strides = array<i32>} : memref<8x32xf32, #tpu.memory_space<vmem>>, vector<8x32xf32>,
    %413 = vector.shape_cast %408 : vector<8x1xi1> to vector<8x1xi1>
    %414 = vector.broadcast %413 : vector<8x1xi1> to vector<8x32xi1>
    %415 = arith.select %414, %404, %386 : vector<8x32xi1>, vector<8x32xf32>
    %c0_177 = arith.constant 0 : index
    %c0_178 = arith.constant 0 : index
    %416 = vector.load %arg8[%c0_177, %c0_178] : memref<8x32xf32, #tpu.memory_space<vmem>>, vector<8x32xf32>
    tpu.vector_store %arg8[%c0_177, %c0_178], %415 {strides = array<i32>} : memref<8x32xf32, #tpu.memory_space<vmem>>, vector<8x32xf32>,
    %cst_179 = arith.constant 0.000000e+00 : f32
    %417 = vector.shape_cast %408 : vector<8x1xi1> to vector<8x1xi1>
    %418 = vector.broadcast %417 : vector<8x1xi1> to vector<8x32xi1>
    %419 = vector.broadcast %cst_179 : f32 to vector<8x32xf32>
    %420 = arith.select %418, %406, %419 : vector<8x32xi1>, vector<8x32xf32>
    %421 = arith.index_cast %c1_i32_166 : i32 to index
    %c0_180 = arith.constant 0 : index
    %c0_181 = arith.constant 0 : index
    %422 = vector.load %arg6[%421, %c0_180, %c0_181] : memref<8x8x32xf32, #tpu.memory_space<vmem>>, vector<1x8x32xf32>
    %423 = vector.shape_cast %422 : vector<1x8x32xf32> to vector<8x32xf32>
    %424 = vector.shape_cast %420 : vector<8x32xf32> to vector<1x8x32xf32>
    tpu.vector_store %arg6[%421, %c0_180, %c0_181], %424 {strides = array<i32>} : memref<8x8x32xf32, #tpu.memory_space<vmem>>, vector<1x8x32xf32>,
    %c2_i32_182 = arith.constant 2 : i32
    %c0_183 = arith.constant 0 : index
    %c0_184 = arith.constant 0 : index
    %425 = vector.load %arg7[%c0_183, %c0_184] : memref<8x32xf32, #tpu.memory_space<vmem>>, vector<8x32xf32>
    %c0_185 = arith.constant 0 : index
    %c0_186 = arith.constant 0 : index
    %426 = vector.load %arg8[%c0_185, %c0_186] : memref<8x32xf32, #tpu.memory_space<vmem>>, vector<8x32xf32>
    %427 = arith.index_cast %c2_i32_182 : i32 to index
    %c0_187 = arith.constant 0 : index
    %c0_188 = arith.constant 0 : index
    %428 = vector.load %arg9[%427, %c0_187, %c0_188] : memref<8x8x128xf32, #tpu.memory_space<vmem>>, vector<1x8x128xf32>
    %429 = vector.shape_cast %428 : vector<1x8x128xf32> to vector<8x128xf32>
    %cst_189 = arith.constant dense<0.000000e+00> : vector<8x128xf32>
    %430 = tpu.matmul %425, %340, %cst_189 {dimension_numbers = #tpu.dot_dimension_numbers<[1], [0], [0], [1], [0, 0, 1, 1], [], []>} : vector<8x32xf32>, vector<32x128xf32>, vector<8x128xf32> -> vector<8x128xf32>
    %431 = arith.addf %429, %430 : vector<8x128xf32>
    %432 = arith.negf %431 : vector<8x128xf32>
    %433 = math.exp %432 : vector<8x128xf32>
    %cst_190 = arith.constant 1.000000e+00 : f32
    %434 = vector.broadcast %cst_190 : f32 to vector<8x128xf32>
    %435 = arith.addf %434, %433 : vector<8x128xf32>
    %436 = arith.divf %434, %435 : vector<8x128xf32>
    %437 = math.tanh %431 : vector<8x128xf32>
    %438 = vector.extract_strided_slice %436 {offsets = [0, 0], sizes = [8, 32], strides = [1, 1]} : vector<8x128xf32> to vector<8x32xf32>
    %439 = vector.extract_strided_slice %436 {offsets = [0, 32], sizes = [8, 32], strides = [1, 1]} : vector<8x128xf32> to vector<8x32xf32>
    %440 = vector.extract_strided_slice %437 {offsets = [0, 64], sizes = [8, 32], strides = [1, 1]} : vector<8x128xf32> to vector<8x32xf32>
    %441 = vector.extract_strided_slice %436 {offsets = [0, 96], sizes = [8, 32], strides = [1, 1]} : vector<8x128xf32> to vector<8x32xf32>
    %442 = arith.mulf %439, %426 : vector<8x32xf32>
    %443 = arith.mulf %438, %440 : vector<8x32xf32>
    %444 = arith.addf %442, %443 : vector<8x32xf32>
    %445 = math.tanh %444 : vector<8x32xf32>
    %446 = arith.mulf %441, %445 : vector<8x32xf32>
    %447 = vector.broadcast %c2_i32_182 : i32 to vector<8x1xi32>
    %448 = arith.cmpi slt, %447, %0 : vector<8x1xi32>
    %449 = vector.shape_cast %448 : vector<8x1xi1> to vector<8x1xi1>
    %450 = vector.broadcast %449 : vector<8x1xi1> to vector<8x32xi1>
    %451 = arith.select %450, %446, %425 : vector<8x32xi1>, vector<8x32xf32>
    %c0_191 = arith.constant 0 : index
    %c0_192 = arith.constant 0 : index
    %452 = vector.load %arg7[%c0_191, %c0_192] : memref<8x32xf32, #tpu.memory_space<vmem>>, vector<8x32xf32>
    tpu.vector_store %arg7[%c0_191, %c0_192], %451 {strides = array<i32>} : memref<8x32xf32, #tpu.memory_space<vmem>>, vector<8x32xf32>,
    %453 = vector.shape_cast %448 : vector<8x1xi1> to vector<8x1xi1>
    %454 = vector.broadcast %453 : vector<8x1xi1> to vector<8x32xi1>
    %455 = arith.select %454, %444, %426 : vector<8x32xi1>, vector<8x32xf32>
    %c0_193 = arith.constant 0 : index
    %c0_194 = arith.constant 0 : index
    %456 = vector.load %arg8[%c0_193, %c0_194] : memref<8x32xf32, #tpu.memory_space<vmem>>, vector<8x32xf32>
    tpu.vector_store %arg8[%c0_193, %c0_194], %455 {strides = array<i32>} : memref<8x32xf32, #tpu.memory_space<vmem>>, vector<8x32xf32>,
    %cst_195 = arith.constant 0.000000e+00 : f32
    %457 = vector.shape_cast %448 : vector<8x1xi1> to vector<8x1xi1>
    %458 = vector.broadcast %457 : vector<8x1xi1> to vector<8x32xi1>
    %459 = vector.broadcast %cst_195 : f32 to vector<8x32xf32>
    %460 = arith.select %458, %446, %459 : vector<8x32xi1>, vector<8x32xf32>
    %461 = arith.index_cast %c2_i32_182 : i32 to index
    %c0_196 = arith.constant 0 : index
    %c0_197 = arith.constant 0 : index
    %462 = vector.load %arg6[%461, %c0_196, %c0_197] : memref<8x8x32xf32, #tpu.memory_space<vmem>>, vector<1x8x32xf32>
    %463 = vector.shape_cast %462 : vector<1x8x32xf32> to vector<8x32xf32>
    %464 = vector.shape_cast %460 : vector<8x32xf32> to vector<1x8x32xf32>
    tpu.vector_store %arg6[%461, %c0_196, %c0_197], %464 {strides = array<i32>} : memref<8x8x32xf32, #tpu.memory_space<vmem>>, vector<1x8x32xf32>,
    %c3_i32_198 = arith.constant 3 : i32
    %c0_199 = arith.constant 0 : index
    %c0_200 = arith.constant 0 : index
    %465 = vector.load %arg7[%c0_199, %c0_200] : memref<8x32xf32, #tpu.memory_space<vmem>>, vector<8x32xf32>
    %c0_201 = arith.constant 0 : index
    %c0_202 = arith.constant 0 : index
    %466 = vector.load %arg8[%c0_201, %c0_202] : memref<8x32xf32, #tpu.memory_space<vmem>>, vector<8x32xf32>
    %467 = arith.index_cast %c3_i32_198 : i32 to index
    %c0_203 = arith.constant 0 : index
    %c0_204 = arith.constant 0 : index
    %468 = vector.load %arg9[%467, %c0_203, %c0_204] : memref<8x8x128xf32, #tpu.memory_space<vmem>>, vector<1x8x128xf32>
    %469 = vector.shape_cast %468 : vector<1x8x128xf32> to vector<8x128xf32>
    %cst_205 = arith.constant dense<0.000000e+00> : vector<8x128xf32>
    %470 = tpu.matmul %465, %340, %cst_205 {dimension_numbers = #tpu.dot_dimension_numbers<[1], [0], [0], [1], [0, 0, 1, 1], [], []>} : vector<8x32xf32>, vector<32x128xf32>, vector<8x128xf32> -> vector<8x128xf32>
    %471 = arith.addf %469, %470 : vector<8x128xf32>
    %472 = arith.negf %471 : vector<8x128xf32>
    %473 = math.exp %472 : vector<8x128xf32>
    %cst_206 = arith.constant 1.000000e+00 : f32
    %474 = vector.broadcast %cst_206 : f32 to vector<8x128xf32>
    %475 = arith.addf %474, %473 : vector<8x128xf32>
    %476 = arith.divf %474, %475 : vector<8x128xf32>
    %477 = math.tanh %471 : vector<8x128xf32>
    %478 = vector.extract_strided_slice %476 {offsets = [0, 0], sizes = [8, 32], strides = [1, 1]} : vector<8x128xf32> to vector<8x32xf32>
    %479 = vector.extract_strided_slice %476 {offsets = [0, 32], sizes = [8, 32], strides = [1, 1]} : vector<8x128xf32> to vector<8x32xf32>
    %480 = vector.extract_strided_slice %477 {offsets = [0, 64], sizes = [8, 32], strides = [1, 1]} : vector<8x128xf32> to vector<8x32xf32>
    %481 = vector.extract_strided_slice %476 {offsets = [0, 96], sizes = [8, 32], strides = [1, 1]} : vector<8x128xf32> to vector<8x32xf32>
    %482 = arith.mulf %479, %466 : vector<8x32xf32>
    %483 = arith.mulf %478, %480 : vector<8x32xf32>
    %484 = arith.addf %482, %483 : vector<8x32xf32>
    %485 = math.tanh %484 : vector<8x32xf32>
    %486 = arith.mulf %481, %485 : vector<8x32xf32>
    %487 = vector.broadcast %c3_i32_198 : i32 to vector<8x1xi32>
    %488 = arith.cmpi slt, %487, %0 : vector<8x1xi32>
    %489 = vector.shape_cast %488 : vector<8x1xi1> to vector<8x1xi1>
    %490 = vector.broadcast %489 : vector<8x1xi1> to vector<8x32xi1>
    %491 = arith.select %490, %486, %465 : vector<8x32xi1>, vector<8x32xf32>
    %c0_207 = arith.constant 0 : index
    %c0_208 = arith.constant 0 : index
    %492 = vector.load %arg7[%c0_207, %c0_208] : memref<8x32xf32, #tpu.memory_space<vmem>>, vector<8x32xf32>
    tpu.vector_store %arg7[%c0_207, %c0_208], %491 {strides = array<i32>} : memref<8x32xf32, #tpu.memory_space<vmem>>, vector<8x32xf32>,
    %493 = vector.shape_cast %488 : vector<8x1xi1> to vector<8x1xi1>
    %494 = vector.broadcast %493 : vector<8x1xi1> to vector<8x32xi1>
    %495 = arith.select %494, %484, %466 : vector<8x32xi1>, vector<8x32xf32>
    %c0_209 = arith.constant 0 : index
    %c0_210 = arith.constant 0 : index
    %496 = vector.load %arg8[%c0_209, %c0_210] : memref<8x32xf32, #tpu.memory_space<vmem>>, vector<8x32xf32>
    tpu.vector_store %arg8[%c0_209, %c0_210], %495 {strides = array<i32>} : memref<8x32xf32, #tpu.memory_space<vmem>>, vector<8x32xf32>,
    %cst_211 = arith.constant 0.000000e+00 : f32
    %497 = vector.shape_cast %488 : vector<8x1xi1> to vector<8x1xi1>
    %498 = vector.broadcast %497 : vector<8x1xi1> to vector<8x32xi1>
    %499 = vector.broadcast %cst_211 : f32 to vector<8x32xf32>
    %500 = arith.select %498, %486, %499 : vector<8x32xi1>, vector<8x32xf32>
    %501 = arith.index_cast %c3_i32_198 : i32 to index
    %c0_212 = arith.constant 0 : index
    %c0_213 = arith.constant 0 : index
    %502 = vector.load %arg6[%501, %c0_212, %c0_213] : memref<8x8x32xf32, #tpu.memory_space<vmem>>, vector<1x8x32xf32>
    %503 = vector.shape_cast %502 : vector<1x8x32xf32> to vector<8x32xf32>
    %504 = vector.shape_cast %500 : vector<8x32xf32> to vector<1x8x32xf32>
    tpu.vector_store %arg6[%501, %c0_212, %c0_213], %504 {strides = array<i32>} : memref<8x8x32xf32, #tpu.memory_space<vmem>>, vector<1x8x32xf32>,
    %c4_i32_214 = arith.constant 4 : i32
    %c0_215 = arith.constant 0 : index
    %c0_216 = arith.constant 0 : index
    %505 = vector.load %arg7[%c0_215, %c0_216] : memref<8x32xf32, #tpu.memory_space<vmem>>, vector<8x32xf32>
    %c0_217 = arith.constant 0 : index
    %c0_218 = arith.constant 0 : index
    %506 = vector.load %arg8[%c0_217, %c0_218] : memref<8x32xf32, #tpu.memory_space<vmem>>, vector<8x32xf32>
    %507 = arith.index_cast %c4_i32_214 : i32 to index
    %c0_219 = arith.constant 0 : index
    %c0_220 = arith.constant 0 : index
    %508 = vector.load %arg9[%507, %c0_219, %c0_220] : memref<8x8x128xf32, #tpu.memory_space<vmem>>, vector<1x8x128xf32>
    %509 = vector.shape_cast %508 : vector<1x8x128xf32> to vector<8x128xf32>
    %cst_221 = arith.constant dense<0.000000e+00> : vector<8x128xf32>
    %510 = tpu.matmul %505, %340, %cst_221 {dimension_numbers = #tpu.dot_dimension_numbers<[1], [0], [0], [1], [0, 0, 1, 1], [], []>} : vector<8x32xf32>, vector<32x128xf32>, vector<8x128xf32> -> vector<8x128xf32>
    %511 = arith.addf %509, %510 : vector<8x128xf32>
    %512 = arith.negf %511 : vector<8x128xf32>
    %513 = math.exp %512 : vector<8x128xf32>
    %cst_222 = arith.constant 1.000000e+00 : f32
    %514 = vector.broadcast %cst_222 : f32 to vector<8x128xf32>
    %515 = arith.addf %514, %513 : vector<8x128xf32>
    %516 = arith.divf %514, %515 : vector<8x128xf32>
    %517 = math.tanh %511 : vector<8x128xf32>
    %518 = vector.extract_strided_slice %516 {offsets = [0, 0], sizes = [8, 32], strides = [1, 1]} : vector<8x128xf32> to vector<8x32xf32>
    %519 = vector.extract_strided_slice %516 {offsets = [0, 32], sizes = [8, 32], strides = [1, 1]} : vector<8x128xf32> to vector<8x32xf32>
    %520 = vector.extract_strided_slice %517 {offsets = [0, 64], sizes = [8, 32], strides = [1, 1]} : vector<8x128xf32> to vector<8x32xf32>
    %521 = vector.extract_strided_slice %516 {offsets = [0, 96], sizes = [8, 32], strides = [1, 1]} : vector<8x128xf32> to vector<8x32xf32>
    %522 = arith.mulf %519, %506 : vector<8x32xf32>
    %523 = arith.mulf %518, %520 : vector<8x32xf32>
    %524 = arith.addf %522, %523 : vector<8x32xf32>
    %525 = math.tanh %524 : vector<8x32xf32>
    %526 = arith.mulf %521, %525 : vector<8x32xf32>
    %527 = vector.broadcast %c4_i32_214 : i32 to vector<8x1xi32>
    %528 = arith.cmpi slt, %527, %0 : vector<8x1xi32>
    %529 = vector.shape_cast %528 : vector<8x1xi1> to vector<8x1xi1>
    %530 = vector.broadcast %529 : vector<8x1xi1> to vector<8x32xi1>
    %531 = arith.select %530, %526, %505 : vector<8x32xi1>, vector<8x32xf32>
    %c0_223 = arith.constant 0 : index
    %c0_224 = arith.constant 0 : index
    %532 = vector.load %arg7[%c0_223, %c0_224] : memref<8x32xf32, #tpu.memory_space<vmem>>, vector<8x32xf32>
    tpu.vector_store %arg7[%c0_223, %c0_224], %531 {strides = array<i32>} : memref<8x32xf32, #tpu.memory_space<vmem>>, vector<8x32xf32>,
    %533 = vector.shape_cast %528 : vector<8x1xi1> to vector<8x1xi1>
    %534 = vector.broadcast %533 : vector<8x1xi1> to vector<8x32xi1>
    %535 = arith.select %534, %524, %506 : vector<8x32xi1>, vector<8x32xf32>
    %c0_225 = arith.constant 0 : index
    %c0_226 = arith.constant 0 : index
    %536 = vector.load %arg8[%c0_225, %c0_226] : memref<8x32xf32, #tpu.memory_space<vmem>>, vector<8x32xf32>
    tpu.vector_store %arg8[%c0_225, %c0_226], %535 {strides = array<i32>} : memref<8x32xf32, #tpu.memory_space<vmem>>, vector<8x32xf32>,
    %cst_227 = arith.constant 0.000000e+00 : f32
    %537 = vector.shape_cast %528 : vector<8x1xi1> to vector<8x1xi1>
    %538 = vector.broadcast %537 : vector<8x1xi1> to vector<8x32xi1>
    %539 = vector.broadcast %cst_227 : f32 to vector<8x32xf32>
    %540 = arith.select %538, %526, %539 : vector<8x32xi1>, vector<8x32xf32>
    %541 = arith.index_cast %c4_i32_214 : i32 to index
    %c0_228 = arith.constant 0 : index
    %c0_229 = arith.constant 0 : index
    %542 = vector.load %arg6[%541, %c0_228, %c0_229] : memref<8x8x32xf32, #tpu.memory_space<vmem>>, vector<1x8x32xf32>
    %543 = vector.shape_cast %542 : vector<1x8x32xf32> to vector<8x32xf32>
    %544 = vector.shape_cast %540 : vector<8x32xf32> to vector<1x8x32xf32>
    tpu.vector_store %arg6[%541, %c0_228, %c0_229], %544 {strides = array<i32>} : memref<8x8x32xf32, #tpu.memory_space<vmem>>, vector<1x8x32xf32>,
    %c5_i32_230 = arith.constant 5 : i32
    %c0_231 = arith.constant 0 : index
    %c0_232 = arith.constant 0 : index
    %545 = vector.load %arg7[%c0_231, %c0_232] : memref<8x32xf32, #tpu.memory_space<vmem>>, vector<8x32xf32>
    %c0_233 = arith.constant 0 : index
    %c0_234 = arith.constant 0 : index
    %546 = vector.load %arg8[%c0_233, %c0_234] : memref<8x32xf32, #tpu.memory_space<vmem>>, vector<8x32xf32>
    %547 = arith.index_cast %c5_i32_230 : i32 to index
    %c0_235 = arith.constant 0 : index
    %c0_236 = arith.constant 0 : index
    %548 = vector.load %arg9[%547, %c0_235, %c0_236] : memref<8x8x128xf32, #tpu.memory_space<vmem>>, vector<1x8x128xf32>
    %549 = vector.shape_cast %548 : vector<1x8x128xf32> to vector<8x128xf32>
    %cst_237 = arith.constant dense<0.000000e+00> : vector<8x128xf32>
    %550 = tpu.matmul %545, %340, %cst_237 {dimension_numbers = #tpu.dot_dimension_numbers<[1], [0], [0], [1], [0, 0, 1, 1], [], []>} : vector<8x32xf32>, vector<32x128xf32>, vector<8x128xf32> -> vector<8x128xf32>
    %551 = arith.addf %549, %550 : vector<8x128xf32>
    %552 = arith.negf %551 : vector<8x128xf32>
    %553 = math.exp %552 : vector<8x128xf32>
    %cst_238 = arith.constant 1.000000e+00 : f32
    %554 = vector.broadcast %cst_238 : f32 to vector<8x128xf32>
    %555 = arith.addf %554, %553 : vector<8x128xf32>
    %556 = arith.divf %554, %555 : vector<8x128xf32>
    %557 = math.tanh %551 : vector<8x128xf32>
    %558 = vector.extract_strided_slice %556 {offsets = [0, 0], sizes = [8, 32], strides = [1, 1]} : vector<8x128xf32> to vector<8x32xf32>
    %559 = vector.extract_strided_slice %556 {offsets = [0, 32], sizes = [8, 32], strides = [1, 1]} : vector<8x128xf32> to vector<8x32xf32>
    %560 = vector.extract_strided_slice %557 {offsets = [0, 64], sizes = [8, 32], strides = [1, 1]} : vector<8x128xf32> to vector<8x32xf32>
    %561 = vector.extract_strided_slice %556 {offsets = [0, 96], sizes = [8, 32], strides = [1, 1]} : vector<8x128xf32> to vector<8x32xf32>
    %562 = arith.mulf %559, %546 : vector<8x32xf32>
    %563 = arith.mulf %558, %560 : vector<8x32xf32>
    %564 = arith.addf %562, %563 : vector<8x32xf32>
    %565 = math.tanh %564 : vector<8x32xf32>
    %566 = arith.mulf %561, %565 : vector<8x32xf32>
    %567 = vector.broadcast %c5_i32_230 : i32 to vector<8x1xi32>
    %568 = arith.cmpi slt, %567, %0 : vector<8x1xi32>
    %569 = vector.shape_cast %568 : vector<8x1xi1> to vector<8x1xi1>
    %570 = vector.broadcast %569 : vector<8x1xi1> to vector<8x32xi1>
    %571 = arith.select %570, %566, %545 : vector<8x32xi1>, vector<8x32xf32>
    %c0_239 = arith.constant 0 : index
    %c0_240 = arith.constant 0 : index
    %572 = vector.load %arg7[%c0_239, %c0_240] : memref<8x32xf32, #tpu.memory_space<vmem>>, vector<8x32xf32>
    tpu.vector_store %arg7[%c0_239, %c0_240], %571 {strides = array<i32>} : memref<8x32xf32, #tpu.memory_space<vmem>>, vector<8x32xf32>,
    %573 = vector.shape_cast %568 : vector<8x1xi1> to vector<8x1xi1>
    %574 = vector.broadcast %573 : vector<8x1xi1> to vector<8x32xi1>
    %575 = arith.select %574, %564, %546 : vector<8x32xi1>, vector<8x32xf32>
    %c0_241 = arith.constant 0 : index
    %c0_242 = arith.constant 0 : index
    %576 = vector.load %arg8[%c0_241, %c0_242] : memref<8x32xf32, #tpu.memory_space<vmem>>, vector<8x32xf32>
    tpu.vector_store %arg8[%c0_241, %c0_242], %575 {strides = array<i32>} : memref<8x32xf32, #tpu.memory_space<vmem>>, vector<8x32xf32>,
    %cst_243 = arith.constant 0.000000e+00 : f32
    %577 = vector.shape_cast %568 : vector<8x1xi1> to vector<8x1xi1>
    %578 = vector.broadcast %577 : vector<8x1xi1> to vector<8x32xi1>
    %579 = vector.broadcast %cst_243 : f32 to vector<8x32xf32>
    %580 = arith.select %578, %566, %579 : vector<8x32xi1>, vector<8x32xf32>
    %581 = arith.index_cast %c5_i32_230 : i32 to index
    %c0_244 = arith.constant 0 : index
    %c0_245 = arith.constant 0 : index
    %582 = vector.load %arg6[%581, %c0_244, %c0_245] : memref<8x8x32xf32, #tpu.memory_space<vmem>>, vector<1x8x32xf32>
    %583 = vector.shape_cast %582 : vector<1x8x32xf32> to vector<8x32xf32>
    %584 = vector.shape_cast %580 : vector<8x32xf32> to vector<1x8x32xf32>
    tpu.vector_store %arg6[%581, %c0_244, %c0_245], %584 {strides = array<i32>} : memref<8x8x32xf32, #tpu.memory_space<vmem>>, vector<1x8x32xf32>,
    %c6_i32_246 = arith.constant 6 : i32
    %c0_247 = arith.constant 0 : index
    %c0_248 = arith.constant 0 : index
    %585 = vector.load %arg7[%c0_247, %c0_248] : memref<8x32xf32, #tpu.memory_space<vmem>>, vector<8x32xf32>
    %c0_249 = arith.constant 0 : index
    %c0_250 = arith.constant 0 : index
    %586 = vector.load %arg8[%c0_249, %c0_250] : memref<8x32xf32, #tpu.memory_space<vmem>>, vector<8x32xf32>
    %587 = arith.index_cast %c6_i32_246 : i32 to index
    %c0_251 = arith.constant 0 : index
    %c0_252 = arith.constant 0 : index
    %588 = vector.load %arg9[%587, %c0_251, %c0_252] : memref<8x8x128xf32, #tpu.memory_space<vmem>>, vector<1x8x128xf32>
    %589 = vector.shape_cast %588 : vector<1x8x128xf32> to vector<8x128xf32>
    %cst_253 = arith.constant dense<0.000000e+00> : vector<8x128xf32>
    %590 = tpu.matmul %585, %340, %cst_253 {dimension_numbers = #tpu.dot_dimension_numbers<[1], [0], [0], [1], [0, 0, 1, 1], [], []>} : vector<8x32xf32>, vector<32x128xf32>, vector<8x128xf32> -> vector<8x128xf32>
    %591 = arith.addf %589, %590 : vector<8x128xf32>
    %592 = arith.negf %591 : vector<8x128xf32>
    %593 = math.exp %592 : vector<8x128xf32>
    %cst_254 = arith.constant 1.000000e+00 : f32
    %594 = vector.broadcast %cst_254 : f32 to vector<8x128xf32>
    %595 = arith.addf %594, %593 : vector<8x128xf32>
    %596 = arith.divf %594, %595 : vector<8x128xf32>
    %597 = math.tanh %591 : vector<8x128xf32>
    %598 = vector.extract_strided_slice %596 {offsets = [0, 0], sizes = [8, 32], strides = [1, 1]} : vector<8x128xf32> to vector<8x32xf32>
    %599 = vector.extract_strided_slice %596 {offsets = [0, 32], sizes = [8, 32], strides = [1, 1]} : vector<8x128xf32> to vector<8x32xf32>
    %600 = vector.extract_strided_slice %597 {offsets = [0, 64], sizes = [8, 32], strides = [1, 1]} : vector<8x128xf32> to vector<8x32xf32>
    %601 = vector.extract_strided_slice %596 {offsets = [0, 96], sizes = [8, 32], strides = [1, 1]} : vector<8x128xf32> to vector<8x32xf32>
    %602 = arith.mulf %599, %586 : vector<8x32xf32>
    %603 = arith.mulf %598, %600 : vector<8x32xf32>
    %604 = arith.addf %602, %603 : vector<8x32xf32>
    %605 = math.tanh %604 : vector<8x32xf32>
    %606 = arith.mulf %601, %605 : vector<8x32xf32>
    %607 = vector.broadcast %c6_i32_246 : i32 to vector<8x1xi32>
    %608 = arith.cmpi slt, %607, %0 : vector<8x1xi32>
    %609 = vector.shape_cast %608 : vector<8x1xi1> to vector<8x1xi1>
    %610 = vector.broadcast %609 : vector<8x1xi1> to vector<8x32xi1>
    %611 = arith.select %610, %606, %585 : vector<8x32xi1>, vector<8x32xf32>
    %c0_255 = arith.constant 0 : index
    %c0_256 = arith.constant 0 : index
    %612 = vector.load %arg7[%c0_255, %c0_256] : memref<8x32xf32, #tpu.memory_space<vmem>>, vector<8x32xf32>
    tpu.vector_store %arg7[%c0_255, %c0_256], %611 {strides = array<i32>} : memref<8x32xf32, #tpu.memory_space<vmem>>, vector<8x32xf32>,
    %613 = vector.shape_cast %608 : vector<8x1xi1> to vector<8x1xi1>
    %614 = vector.broadcast %613 : vector<8x1xi1> to vector<8x32xi1>
    %615 = arith.select %614, %604, %586 : vector<8x32xi1>, vector<8x32xf32>
    %c0_257 = arith.constant 0 : index
    %c0_258 = arith.constant 0 : index
    %616 = vector.load %arg8[%c0_257, %c0_258] : memref<8x32xf32, #tpu.memory_space<vmem>>, vector<8x32xf32>
    tpu.vector_store %arg8[%c0_257, %c0_258], %615 {strides = array<i32>} : memref<8x32xf32, #tpu.memory_space<vmem>>, vector<8x32xf32>,
    %cst_259 = arith.constant 0.000000e+00 : f32
    %617 = vector.shape_cast %608 : vector<8x1xi1> to vector<8x1xi1>
    %618 = vector.broadcast %617 : vector<8x1xi1> to vector<8x32xi1>
    %619 = vector.broadcast %cst_259 : f32 to vector<8x32xf32>
    %620 = arith.select %618, %606, %619 : vector<8x32xi1>, vector<8x32xf32>
    %621 = arith.index_cast %c6_i32_246 : i32 to index
    %c0_260 = arith.constant 0 : index
    %c0_261 = arith.constant 0 : index
    %622 = vector.load %arg6[%621, %c0_260, %c0_261] : memref<8x8x32xf32, #tpu.memory_space<vmem>>, vector<1x8x32xf32>
    %623 = vector.shape_cast %622 : vector<1x8x32xf32> to vector<8x32xf32>
    %624 = vector.shape_cast %620 : vector<8x32xf32> to vector<1x8x32xf32>
    tpu.vector_store %arg6[%621, %c0_260, %c0_261], %624 {strides = array<i32>} : memref<8x8x32xf32, #tpu.memory_space<vmem>>, vector<1x8x32xf32>,
    %c7_i32_262 = arith.constant 7 : i32
    %c0_263 = arith.constant 0 : index
    %c0_264 = arith.constant 0 : index
    %625 = vector.load %arg7[%c0_263, %c0_264] : memref<8x32xf32, #tpu.memory_space<vmem>>, vector<8x32xf32>
    %c0_265 = arith.constant 0 : index
    %c0_266 = arith.constant 0 : index
    %626 = vector.load %arg8[%c0_265, %c0_266] : memref<8x32xf32, #tpu.memory_space<vmem>>, vector<8x32xf32>
    %627 = arith.index_cast %c7_i32_262 : i32 to index
    %c0_267 = arith.constant 0 : index
    %c0_268 = arith.constant 0 : index
    %628 = vector.load %arg9[%627, %c0_267, %c0_268] : memref<8x8x128xf32, #tpu.memory_space<vmem>>, vector<1x8x128xf32>
    %629 = vector.shape_cast %628 : vector<1x8x128xf32> to vector<8x128xf32>
    %cst_269 = arith.constant dense<0.000000e+00> : vector<8x128xf32>
    %630 = tpu.matmul %625, %340, %cst_269 {dimension_numbers = #tpu.dot_dimension_numbers<[1], [0], [0], [1], [0, 0, 1, 1], [], []>} : vector<8x32xf32>, vector<32x128xf32>, vector<8x128xf32> -> vector<8x128xf32>
    %631 = arith.addf %629, %630 : vector<8x128xf32>
    %632 = arith.negf %631 : vector<8x128xf32>
    %633 = math.exp %632 : vector<8x128xf32>
    %cst_270 = arith.constant 1.000000e+00 : f32
    %634 = vector.broadcast %cst_270 : f32 to vector<8x128xf32>
    %635 = arith.addf %634, %633 : vector<8x128xf32>
    %636 = arith.divf %634, %635 : vector<8x128xf32>
    %637 = math.tanh %631 : vector<8x128xf32>
    %638 = vector.extract_strided_slice %636 {offsets = [0, 0], sizes = [8, 32], strides = [1, 1]} : vector<8x128xf32> to vector<8x32xf32>
    %639 = vector.extract_strided_slice %636 {offsets = [0, 32], sizes = [8, 32], strides = [1, 1]} : vector<8x128xf32> to vector<8x32xf32>
    %640 = vector.extract_strided_slice %637 {offsets = [0, 64], sizes = [8, 32], strides = [1, 1]} : vector<8x128xf32> to vector<8x32xf32>
    %641 = vector.extract_strided_slice %636 {offsets = [0, 96], sizes = [8, 32], strides = [1, 1]} : vector<8x128xf32> to vector<8x32xf32>
    %642 = arith.mulf %639, %626 : vector<8x32xf32>
    %643 = arith.mulf %638, %640 : vector<8x32xf32>
    %644 = arith.addf %642, %643 : vector<8x32xf32>
    %645 = math.tanh %644 : vector<8x32xf32>
    %646 = arith.mulf %641, %645 : vector<8x32xf32>
    %647 = vector.broadcast %c7_i32_262 : i32 to vector<8x1xi32>
    %648 = arith.cmpi slt, %647, %0 : vector<8x1xi32>
    %649 = vector.shape_cast %648 : vector<8x1xi1> to vector<8x1xi1>
    %650 = vector.broadcast %649 : vector<8x1xi1> to vector<8x32xi1>
    %651 = arith.select %650, %646, %625 : vector<8x32xi1>, vector<8x32xf32>
    %c0_271 = arith.constant 0 : index
    %c0_272 = arith.constant 0 : index
    %652 = vector.load %arg7[%c0_271, %c0_272] : memref<8x32xf32, #tpu.memory_space<vmem>>, vector<8x32xf32>
    tpu.vector_store %arg7[%c0_271, %c0_272], %651 {strides = array<i32>} : memref<8x32xf32, #tpu.memory_space<vmem>>, vector<8x32xf32>,
    %653 = vector.shape_cast %648 : vector<8x1xi1> to vector<8x1xi1>
    %654 = vector.broadcast %653 : vector<8x1xi1> to vector<8x32xi1>
    %655 = arith.select %654, %644, %626 : vector<8x32xi1>, vector<8x32xf32>
    %c0_273 = arith.constant 0 : index
    %c0_274 = arith.constant 0 : index
    %656 = vector.load %arg8[%c0_273, %c0_274] : memref<8x32xf32, #tpu.memory_space<vmem>>, vector<8x32xf32>
    tpu.vector_store %arg8[%c0_273, %c0_274], %655 {strides = array<i32>} : memref<8x32xf32, #tpu.memory_space<vmem>>, vector<8x32xf32>,
    %cst_275 = arith.constant 0.000000e+00 : f32
    %657 = vector.shape_cast %648 : vector<8x1xi1> to vector<8x1xi1>
    %658 = vector.broadcast %657 : vector<8x1xi1> to vector<8x32xi1>
    %659 = vector.broadcast %cst_275 : f32 to vector<8x32xf32>
    %660 = arith.select %658, %646, %659 : vector<8x32xi1>, vector<8x32xf32>
    %661 = arith.index_cast %c7_i32_262 : i32 to index
    %c0_276 = arith.constant 0 : index
    %c0_277 = arith.constant 0 : index
    %662 = vector.load %arg6[%661, %c0_276, %c0_277] : memref<8x8x32xf32, #tpu.memory_space<vmem>>, vector<1x8x32xf32>
    %663 = vector.shape_cast %662 : vector<1x8x32xf32> to vector<8x32xf32>
    %664 = vector.shape_cast %660 : vector<8x32xf32> to vector<1x8x32xf32>
    tpu.vector_store %arg6[%661, %c0_276, %c0_277], %664 {strides = array<i32>} : memref<8x8x32xf32, #tpu.memory_space<vmem>>, vector<1x8x32xf32>,
    %c8_i32_278 = arith.constant 8 : i32
    return
  }
  func.func @transform_0(%arg0: i32) -> (i32, i32, i32) {
    %c0_i32 = arith.constant 0 : i32
    %c0_i32_0 = arith.constant 0 : i32
    %c0_i32_1 = arith.constant 0 : i32
    return %c0_i32, %arg0, %c0_i32_0 : i32, i32, i32
  }
  func.func @transform_1(%arg0: i32) -> (i32, i32) {
    %c0_i32 = arith.constant 0 : i32
    %c0_i32_0 = arith.constant 0 : i32
    return %arg0, %c0_i32 : i32, i32
  }
  func.func @transform_2(%arg0: i32) -> (i32, i32, i32) {
    %c0_i32 = arith.constant 0 : i32
    %c0_i32_0 = arith.constant 0 : i32
    %c0_i32_1 = arith.constant 0 : i32
    %c0_i32_2 = arith.constant 0 : i32
    return %c0_i32, %c0_i32_0, %c0_i32_1 : i32, i32, i32
  }
  func.func @transform_3(%arg0: i32) -> (i32, i32, i32) {
    %c0_i32 = arith.constant 0 : i32
    %c0_i32_0 = arith.constant 0 : i32
    %c0_i32_1 = arith.constant 0 : i32
    %c0_i32_2 = arith.constant 0 : i32
    return %c0_i32, %c0_i32_0, %c0_i32_1 : i32, i32, i32
  }
  func.func @transform_4(%arg0: i32) -> (i32, i32, i32) {
    %c0_i32 = arith.constant 0 : i32
    %c0_i32_0 = arith.constant 0 : i32
    %c0_i32_1 = arith.constant 0 : i32
    %c0_i32_2 = arith.constant 0 : i32
    return %c0_i32, %c0_i32_0, %c0_i32_1 : i32, i32, i32
  }
  func.func @transform_5(%arg0: i32) -> (i32, i32, i32) {
    %c0_i32 = arith.constant 0 : i32
    %c0_i32_0 = arith.constant 0 : i32
    %c0_i32_1 = arith.constant 0 : i32
    return %c0_i32, %arg0, %c0_i32_0 : i32, i32, i32
  }
}

</mosaic_0001>

<bundles_post_ra>
// kernel: get_hidden_state.1
= control target key start
LH: loop header
LB: loop body
LE: loop exit
PB: predicated region body
PF: predicated region fallthrough
CT: control target
= control target key end

     0   :  { %vm25_vm0 = vcmask 261120   ;;  %v2885_v0 = vmov 0.0|0.0   ;;  %vm2886_vm1 = vmmov 0   ;;  %v2887_v4 = vmov 0.0   ;;  %s2889_s28 = smov 64   ;;  %s2890_s29 = smov 32   ;;  %s3590_s3 = inlined_call_operand.vmem [shape: f32[2,32,128], index: 3, kind: input, shape index: {}]   ;;  %s3591_s0 = inlined_call_operand.vmem [shape: f32[8,8,128], index: 0, kind: input, shape index: {}]   ;;  %s3592_s1 = inlined_call_operand.vmem [shape: s32[8,1], index: 1, kind: input, shape index: {}]   ;;  %s3593_s5 = inlined_call_operand.vmem [shape: f32[8,8,32], index: 5, kind: output, shape index: {}]   ;;  %s3594_s2 = inlined_call_operand.vmem [shape: f32[1,32,128], index: 2, kind: input, shape index: {}]   ;;  %s3595_s4 = inlined_call_operand.vmem [shape: f32[2,1,128], index: 4, kind: input, shape index: {}]  }
   0x1   :  { %2644 = vmatprep.subr.bf16.mxu0 %v2885_v0  ;;  %v21_v1 = vld [vmem:[%s3590_s3] sm:$0xff]  ;;  %v22_v2 = vld [vmem:[%s3590_s3 + $0x8] sm:$0xff]  ;;  %v23_v3 = vld [vmem:[%s3590_s3 + $0x10] sm:$0xff]  ;;  %2456 = vmatprep.mubr.msk.f32.mxu0 %vm2886_vm1, %v2887_v4  ;;  %26 = vst.msk [vmem:[#allocation2] sm:$0xff] %vm25_vm0, %v2887_v4  ;;  %v2888_v13 = vmov 0   ;;  %s2891_s7 = smov 96  }
   0x2   :  { %27 = vst.msk [vmem:[#allocation3] sm:$0xff] %vm25_vm0, %v2887_v4  ;;  %v2938_v5 = vpack.c.bf16 %v22_v2, %v21_v1  ;;  %v24_v6 = vld [vmem:[%s3590_s3 + $0x18] sm:$0xff]  ;;  %2650 = vmatprep.subr.bf16.mxu1 %v2885_v0  ;;  %2467 = vmatprep.mubr.msk.f32.mxu1 %vm2886_vm1, %v2887_v4  ;;  %v30_v9 = vld [vmem:[%s3591_s0] sm:$0xff]  ;;  %v2291_v40 = vld [vmem:[%s3591_s0 + $0x8] sm:$0xff] }
   0x3   :  { %v2947_v7 = vpack.c.bf16 %v24_v6, %v23_v3  ;;  %2755 = vset.pattern.permute.xlu1 %v2888_v13  ;;  %2756 = vset.pattern.permute.xlu0 %v2888_v13  ;;  %v2973_v19 = vld [vmem:[%s3592_s1] sm:$0xff]  ;;  %v2295_v6 = vld [vmem:[%s3591_s0 + $0x10] sm:$0xff] }
   0x4   :  { %2646 = vmatpush3.bf16.msra.mxu0 %v2938_v5  ;;  %2652 = vmatpush3.bf16.msra.mxu1 %v2938_v5  ;;  %vm133_vm2 = vcmp.gt.s32.totalorder %v2973_v19, 0  ;;  %vm266_vm4 = vcmp.gt.s32.totalorder %v2973_v19, 1  ;;  %vm400_vm6 = vcmp.gt.s32.totalorder %v2973_v19, 2  ;;  %vm534_vm8 = vcmp.gt.s32.totalorder %v2973_v19, 3 }
   0x5   :  { %2647 = vmatprep.subr.bf16.mxu0 %v2885_v0  ;;  %2653 = vmatprep.subr.bf16.mxu1 %v2885_v0  ;;  %v134_v23 = vsel %vm133_vm2, 1, %v2888_v13  ;;  %v267_v37 = vsel %vm266_vm4, 1, %v2888_v13  ;;  %v401_v62 = vsel %vm400_vm6, 1, %v2888_v13  ;;  %vm668_vm10 = vcmp.gt.s32.totalorder %v2973_v19, 4 }
   0x6   :  { %vm802_vm12 = vcmp.gt.s32.totalorder %v2973_v19, 5  ;;  %vm936_vm14 = vcmp.gt.s32.totalorder %v2973_v19, 6  ;;  %vm1070_vm2 = vcmp.gt.s32.totalorder %v2973_v19, 7 }
   0x8   :  { %2649 = vmatpush3.bf16.msra.mxu0 %v2947_v7  ;;  %v28_v8 = vld [vmem:[#allocation2] sm:$0xff]  ;;  %2655 = vmatpush3.bf16.msra.mxu1 %v2947_v7 }
   0x9   :  { %2656 = vmatprep.subr.bf16.mxu0 %v2885_v0  ;;  %2662 = vmatprep.subr.bf16.mxu1 %v2885_v0  ;;  %v29_v15 = vld [vmem:[#allocation3] sm:$0xff] }
   0xb   :  { %2457 = vmatmul.mubr.msk.f32.vlgmr.msra.gmra.mrb[0].mxu0 %vm25_vm0, %v28_v8 }
   0xc   :  { %2658 = vmatpush3.bf16.msra.mxu0 %v2938_v5  ;;  %2478 = vmatprep.mubr.msk.f32.mxu0 %vm2886_vm1, %v2887_v4 }
   0xd   :  { %2659 = vmatprep.subr.bf16.mxu0 %v2885_v0 }
  0x10   :  { %2661 = vmatpush3.bf16.msra.mxu0 %v2947_v7 }
  0x11   :  { %2668 = vmatprep.subr.bf16.mxu0 %v2885_v0 }
  0xde   :  { %v100_v10 = vpop.f32.mrb[0].mxu0 }
  0xdf   :  { %v104_v11 = vadd.f32 %v100_v10, %v30_v9  ;;  %v2458_v12 = vpop.f32.mrb[1].mxu0 }
  0xe1   :  { %2757 = vtanh.f32 %v104_v11  ;;  %v2290_v16 = vmul.f32 -1.442695, %v104_v11 }
  0xe3   :  { %2759 = vpow2.f32 %v2290_v16 }
  0xeb   :  { %v2758_v14 = vpop.eup %2757 }
  0xec   :  { %118 = vrot.lane.b32.xlu0 %v2758_v14, %s2889_s28 }
  0xed   :  { %v2760_v17 = vpop.eup %2759 }
  0xee   :  { %v108_v18 = vadd.f32 1.0, %v2760_v17 }
  0xf0   :  { %113 = vrot.lane.b32.xlu0 %v29_v15, %s2890_s29  ;;  %2761 = vrcp.f32 %v108_v18 }
  0xfa   :  { %v2762_v20 = vpop.eup %2761 }
 0x15e   :  { %v119_v21 = vpop.permute.xlu0 %118 }
 0x15f   :  { %v121_v22 = vmul.f32 %v2762_v20, %v119_v21 }
 0x161   :  { %123 = vrot.lane.b32.xlu1 %v121_v22, %s2890_s29 }
 0x162   :  { %v114_v24 = vpop.permute.xlu0 %113 }
 0x163   :  { %v116_v25 = vmul.f32 %v2762_v20, %v114_v24 }
 0x165   :  { %136 = vperm.xlu1 %2755, %v134_v23  }
 0x169   :  { %139 = vrot.lane.b32.xlu1 %v28_v8, %s2891_s7 }
 0x1d3   :  { %v124_v26 = vpop.permute.xlu1 %123 }
 0x1d4   :  { %v126_v27 = vadd.f32 %v124_v26, %v116_v25 }
 0x1d6   :  { %2763 = vtanh.f32 %v126_v27 }
 0x1e0   :  { %v2764_v28 = vpop.eup %2763 }
 0x1e1   :  { %129 = vrot.lane.b32.xlu0 %v2764_v28, %s2889_s28 }
 0x1e4   :  { %v2980_v29 = vpop.permute.xlu1 %136 }
 0x1e5   :  { %vm138_vm3 = vcmp.eq.s32.totalorder %v2980_v29, 1 }
 0x1e6   :  { %v148_v30 = vsel %vm138_vm3, %v126_v27, %v114_v24 }
 0x1e7   :  { %150 = vrot.lane.b32.xlu1 %v148_v30, %s2891_s7 }
 0x1e8   :  { %v140_v32 = vpop.permute.xlu1 %139 }
 0x253   :  { %v130_v31 = vpop.permute.xlu0 %129 }
 0x254   :  { %v2986_v33 = vmul.f32 %v2762_v20, %v130_v31 }
 0x256   :  { %v142_v34 = vsel %vm138_vm3, %v2986_v33, %v140_v32  ;;  %v535_v32 = vsel %vm534_vm8, 1, %v2888_v13 }
 0x257   :  { %144 = vrot.lane.b32.xlu0 %v142_v34, %s2890_s29 }
 0x259   :  { %v151_v35 = vpop.permute.xlu1 %150 }
 0x25a   :  { %153 = vst.msk [vmem:[#allocation3] sm:$0xff] %vm25_vm0, %v151_v35 }
 0x261   :  { %v161_v36 = vld [vmem:[#allocation3] sm:$0xff] }
 0x262   :  { %246 = vrot.lane.b32.xlu1 %v161_v36, %s2890_s29 }
 0x266   :  { %269 = vperm.xlu1 %2755, %v267_v37  }
 0x2c9   :  { %v145_v38 = vpop.permute.xlu0 %144 }
 0x2ca   :  { %147 = vst.msk [vmem:[#allocation2] sm:$0xff] %vm25_vm0, %v145_v38  ;;  %v2299_v38 = vld [vmem:[%s3591_s0 + $0x18] sm:$0xff] }
 0x2d1   :  { %v160_v39 = vld [vmem:[#allocation2] sm:$0xff] }
 0x2d2   :  { %272 = vrot.lane.b32.xlu1 %v160_v39, %s2891_s7  ;;  %2468 = vmatmul.mubr.msk.f32.vlgmr.msra.gmra.mrb[0].mxu1 %vm25_vm0, %v160_v39 }
 0x2d3   :  { %2664 = vmatpush3.bf16.msra.mxu1 %v2938_v5  ;;  %2489 = vmatprep.mubr.msk.f32.mxu1 %vm2886_vm1, %v2887_v4 }
 0x2d4   :  { %2665 = vmatprep.subr.bf16.mxu1 %v2885_v0  ;;  %v247_v51 = vpop.permute.xlu1 %246 }
 0x2d7   :  { %2667 = vmatpush3.bf16.msra.mxu1 %v2947_v7 }
 0x2d8   :  { %2674 = vmatprep.subr.bf16.mxu1 %v2885_v0 }
 0x2e5   :  { %v3010_v52 = vpop.permute.xlu1 %269 }
 0x2e6   :  { %vm271_vm5 = vcmp.eq.s32.totalorder %v3010_v52, 1 }
 0x344   :  { %v273_v58 = vpop.permute.xlu1 %272 }
 0x3a5   :  { %v233_v41 = vpop.f32.mrb[0].mxu1 }
 0x3a6   :  { %v237_v42 = vadd.f32 %v2291_v40, %v233_v41  ;;  %v2469_v43 = vpop.f32.mrb[1].mxu1 }
 0x3a8   :  { %2765 = vtanh.f32 %v237_v42  ;;  %v2293_v45 = vmul.f32 -1.442695, %v237_v42 }
 0x3aa   :  { %2767 = vpow2.f32 %v2293_v45 }
 0x3b2   :  { %v2766_v44 = vpop.eup %2765 }
 0x3b3   :  { %251 = vrot.lane.b32.xlu0 %v2766_v44, %s2889_s28 }
 0x3b4   :  { %v2768_v46 = vpop.eup %2767 }
 0x3b5   :  { %v241_v47 = vadd.f32 1.0, %v2768_v46 }
 0x3b7   :  { %2769 = vrcp.f32 %v241_v47 }
 0x3c1   :  { %v2770_v48 = vpop.eup %2769 }
 0x3c2   :  { %v249_v53 = vmul.f32 %v2770_v48, %v247_v51 }
 0x425   :  { %v252_v49 = vpop.permute.xlu0 %251 }
 0x426   :  { %v254_v50 = vmul.f32 %v2770_v48, %v252_v49 }
 0x428   :  { %256 = vrot.lane.b32.xlu0 %v254_v50, %s2890_s29 }
 0x49a   :  { %v257_v54 = vpop.permute.xlu0 %256 }
 0x49b   :  { %v259_v55 = vadd.f32 %v257_v54, %v249_v53 }
 0x49d   :  { %2771 = vtanh.f32 %v259_v55  ;;  %v281_v56 = vsel %vm271_vm5, %v259_v55, %v247_v51 }
 0x49e   :  { %283 = vrot.lane.b32.xlu1 %v281_v56, %s2891_s7 }
 0x4a7   :  { %v2772_v57 = vpop.eup %2771 }
 0x4a8   :  { %262 = vrot.lane.b32.xlu0 %v2772_v57, %s2889_s28 }
 0x510   :  { %v284_v59 = vpop.permute.xlu1 %283 }
 0x511   :  { %286 = vst.msk [vmem:[#allocation3] sm:$0xff] %vm25_vm0, %v284_v59 }
 0x518   :  { %v295_v60 = vld [vmem:[#allocation3] sm:$0xff] }
 0x519   :  { %380 = vrot.lane.b32.xlu1 %v295_v60, %s2890_s29 }
 0x51a   :  { %v263_v61 = vpop.permute.xlu0 %262 }
 0x51b   :  { %v3021_v63 = vmul.f32 %v2770_v48, %v263_v61  ;;  %v669_v61 = vsel %vm668_vm10, 1, %v2888_v13 }
 0x51d   :  { %403 = vperm.xlu1 %2755, %v401_v62   ;;  %v275_v1 = vsel %vm271_vm5, %v3021_v63, %v273_v58 }
 0x51e   :  { %277 = vrot.lane.b32.xlu0 %v275_v1, %s2890_s29 }
 0x58b   :  { %v381_v20 = vpop.permute.xlu1 %380 }
 0x590   :  { %v278_v2 = vpop.permute.xlu0 %277 }
 0x591   :  { %280 = vst.msk [vmem:[#allocation2] sm:$0xff] %vm25_vm0, %v278_v2 }
 0x598   :  { %v294_v3 = vld [vmem:[#allocation2] sm:$0xff] }
 0x599   :  { %406 = vrot.lane.b32.xlu1 %v294_v3, %s2891_s7  ;;  %2479 = vmatmul.mubr.msk.f32.vlgmr.msra.gmra.mrb[2].mxu0 %vm25_vm0, %v294_v3 }
 0x59a   :  { %2670 = vmatpush3.bf16.msra.mxu0 %v2938_v5  ;;  %2500 = vmatprep.mubr.msk.f32.mxu0 %vm2886_vm1, %v2887_v4 }
 0x59b   :  { %2671 = vmatprep.subr.bf16.mxu0 %v2885_v0 }
 0x59c   :  { %v3041_v21 = vpop.permute.xlu1 %403 }
 0x59d   :  { %vm405_vm7 = vcmp.eq.s32.totalorder %v3041_v21, 1 }
 0x59e   :  { %2673 = vmatpush3.bf16.msra.mxu0 %v2947_v7 }
 0x59f   :  { %2680 = vmatprep.subr.bf16.mxu0 %v2885_v0 }
 0x60b   :  { %v407_v27 = vpop.permute.xlu1 %406 }
 0x66c   :  { %v367_v8 = vpop.f32.mrb[2].mxu0 }
 0x66d   :  { %v371_v9 = vadd.f32 %v2295_v6, %v367_v8  ;;  %v2480_v10 = vpop.f32.mrb[3].mxu0  ;;  %v2303_v6 = vld [vmem:[%s3591_s0 + $0x20] sm:$0xff] }
 0x66f   :  { %2773 = vtanh.f32 %v371_v9  ;;  %v2297_v12 = vmul.f32 -1.442695, %v371_v9 }
 0x671   :  { %2775 = vpow2.f32 %v2297_v12 }
 0x679   :  { %v2774_v11 = vpop.eup %2773 }
 0x67a   :  { %385 = vrot.lane.b32.xlu0 %v2774_v11, %s2889_s28 }
 0x67b   :  { %v2776_v14 = vpop.eup %2775 }
 0x67c   :  { %v375_v15 = vadd.f32 1.0, %v2776_v14 }
 0x67e   :  { %2777 = vrcp.f32 %v375_v15 }
 0x688   :  { %v2778_v16 = vpop.eup %2777 }
 0x689   :  { %v383_v22 = vmul.f32 %v2778_v16, %v381_v20 }
 0x6ec   :  { %v386_v17 = vpop.permute.xlu0 %385 }
 0x6ed   :  { %v388_v18 = vmul.f32 %v2778_v16, %v386_v17 }
 0x6ef   :  { %390 = vrot.lane.b32.xlu0 %v388_v18, %s2890_s29 }
 0x761   :  { %v391_v23 = vpop.permute.xlu0 %390 }
 0x762   :  { %v393_v24 = vadd.f32 %v391_v23, %v383_v22 }
 0x764   :  { %2779 = vtanh.f32 %v393_v24  ;;  %v415_v25 = vsel %vm405_vm7, %v393_v24, %v381_v20 }
 0x765   :  { %417 = vrot.lane.b32.xlu1 %v415_v25, %s2891_s7 }
 0x76e   :  { %v2780_v26 = vpop.eup %2779 }
 0x76f   :  { %396 = vrot.lane.b32.xlu0 %v2780_v26, %s2889_s28 }
 0x7d7   :  { %v418_v28 = vpop.permute.xlu1 %417 }
 0x7d8   :  { %420 = vst.msk [vmem:[#allocation3] sm:$0xff] %vm25_vm0, %v418_v28 }
 0x7df   :  { %v429_v30 = vld [vmem:[#allocation3] sm:$0xff] }
 0x7e0   :  { %514 = vrot.lane.b32.xlu1 %v429_v30, %s2890_s29 }
 0x7e1   :  { %v397_v31 = vpop.permute.xlu0 %396 }
 0x7e2   :  { %v3052_v34 = vmul.f32 %v2778_v16, %v397_v31 }
 0x7e4   :  { %537 = vperm.xlu1 %2755, %v535_v32   ;;  %v409_v35 = vsel %vm405_vm7, %v3052_v34, %v407_v27 }
 0x7e5   :  { %411 = vrot.lane.b32.xlu0 %v409_v35, %s2890_s29  ;;  %v803_v35 = vsel %vm802_vm12, 1, %v2888_v13 }
 0x852   :  { %v515_v49 = vpop.permute.xlu1 %514 }
 0x857   :  { %v412_v36 = vpop.permute.xlu0 %411 }
 0x858   :  { %414 = vst.msk [vmem:[#allocation2] sm:$0xff] %vm25_vm0, %v412_v36 }
 0x85f   :  { %v428_v37 = vld [vmem:[#allocation2] sm:$0xff] }
 0x860   :  { %540 = vrot.lane.b32.xlu1 %v428_v37, %s2891_s7  ;;  %2490 = vmatmul.mubr.msk.f32.vlgmr.msra.gmra.mrb[2].mxu1 %vm25_vm0, %v428_v37 }
 0x861   :  { %2676 = vmatpush3.bf16.msra.mxu1 %v2938_v5  ;;  %2511 = vmatprep.mubr.msk.f32.mxu1 %vm2886_vm1, %v2887_v4 }
 0x862   :  { %2677 = vmatprep.subr.bf16.mxu1 %v2885_v0 }
 0x863   :  { %v3072_v50 = vpop.permute.xlu1 %537 }
 0x864   :  { %vm539_vm9 = vcmp.eq.s32.totalorder %v3072_v50, 1 }
 0x865   :  { %2679 = vmatpush3.bf16.msra.mxu1 %v2947_v7 }
 0x866   :  { %2686 = vmatprep.subr.bf16.mxu1 %v2885_v0 }
 0x8d2   :  { %v541_v57 = vpop.permute.xlu1 %540 }
 0x933   :  { %v501_v39 = vpop.f32.mrb[2].mxu1 }
 0x934   :  { %v505_v40 = vadd.f32 %v2299_v38, %v501_v39  ;;  %v2491_v41 = vpop.f32.mrb[3].mxu1 }
 0x936   :  { %2781 = vtanh.f32 %v505_v40  ;;  %v2301_v43 = vmul.f32 -1.442695, %v505_v40  ;;  %v2307_v40 = vld [vmem:[%s3591_s0 + $0x28] sm:$0xff] }
 0x938   :  { %2783 = vpow2.f32 %v2301_v43 }
 0x940   :  { %v2782_v42 = vpop.eup %2781 }
 0x941   :  { %519 = vrot.lane.b32.xlu0 %v2782_v42, %s2889_s28 }
 0x942   :  { %v2784_v44 = vpop.eup %2783 }
 0x943   :  { %v509_v45 = vadd.f32 1.0, %v2784_v44 }
 0x945   :  { %2785 = vrcp.f32 %v509_v45 }
 0x94f   :  { %v2786_v46 = vpop.eup %2785 }
 0x950   :  { %v517_v51 = vmul.f32 %v2786_v46, %v515_v49 }
 0x9b3   :  { %v520_v47 = vpop.permute.xlu0 %519 }
 0x9b4   :  { %v522_v48 = vmul.f32 %v2786_v46, %v520_v47 }
 0x9b6   :  { %524 = vrot.lane.b32.xlu0 %v522_v48, %s2890_s29 }
 0xa28   :  { %v525_v53 = vpop.permute.xlu0 %524 }
 0xa29   :  { %v527_v54 = vadd.f32 %v525_v53, %v517_v51 }
 0xa2b   :  { %2787 = vtanh.f32 %v527_v54  ;;  %v549_v55 = vsel %vm539_vm9, %v527_v54, %v515_v49 }
 0xa2c   :  { %551 = vrot.lane.b32.xlu1 %v549_v55, %s2891_s7 }
 0xa35   :  { %v2788_v56 = vpop.eup %2787 }
 0xa36   :  { %530 = vrot.lane.b32.xlu0 %v2788_v56, %s2889_s28 }
 0xa9e   :  { %v552_v58 = vpop.permute.xlu1 %551 }
 0xa9f   :  { %554 = vst.msk [vmem:[#allocation3] sm:$0xff] %vm25_vm0, %v552_v58 }
 0xaa6   :  { %v563_v59 = vld [vmem:[#allocation3] sm:$0xff] }
 0xaa7   :  { %648 = vrot.lane.b32.xlu1 %v563_v59, %s2890_s29 }
 0xaa8   :  { %v531_v60 = vpop.permute.xlu0 %530 }
 0xaa9   :  { %v3083_v62 = vmul.f32 %v2786_v46, %v531_v60 }
 0xaab   :  { %671 = vperm.xlu1 %2755, %v669_v61   ;;  %v543_v1 = vsel %vm539_vm9, %v3083_v62, %v541_v57 }
 0xaac   :  { %545 = vrot.lane.b32.xlu0 %v543_v1, %s2890_s29  ;;  %v937_v1 = vsel %vm936_vm14, 1, %v2888_v13 }
 0xb19   :  { %v649_v20 = vpop.permute.xlu1 %648 }
 0xb1e   :  { %v546_v2 = vpop.permute.xlu0 %545 }
 0xb1f   :  { %548 = vst.msk [vmem:[#allocation2] sm:$0xff] %vm25_vm0, %v546_v2 }
 0xb26   :  { %v562_v3 = vld [vmem:[#allocation2] sm:$0xff] }
 0xb27   :  { %674 = vrot.lane.b32.xlu1 %v562_v3, %s2891_s7  ;;  %2501 = vmatmul.mubr.msk.f32.vlgmr.msra.gmra.mrb[4].mxu0 %vm25_vm0, %v562_v3 }
 0xb28   :  { %2682 = vmatpush3.bf16.msra.mxu0 %v2938_v5  ;;  %2522 = vmatprep.mubr.msk.f32.mxu0 %vm2886_vm1, %v2887_v4 }
 0xb29   :  { %2683 = vmatprep.subr.bf16.mxu0 %v2885_v0 }
 0xb2a   :  { %v3102_v22 = vpop.permute.xlu1 %671 }
 0xb2b   :  { %vm673_vm11 = vcmp.eq.s32.totalorder %v3102_v22, 1 }
 0xb2c   :  { %2685 = vmatpush3.bf16.msra.mxu0 %v2947_v7 }
 0xb99   :  { %v675_v28 = vpop.permute.xlu1 %674 }
 0xbfa   :  { %v635_v8 = vpop.f32.mrb[4].mxu0 }
 0xbfb   :  { %v639_v9 = vadd.f32 %v2303_v6, %v635_v8  ;;  %v2502_v10 = vpop.f32.mrb[5].mxu0 }
 0xbfd   :  { %2789 = vtanh.f32 %v639_v9  ;;  %v2305_v12 = vmul.f32 -1.442695, %v639_v9  ;;  %v2311_v9 = vld [vmem:[%s3591_s0 + $0x30] sm:$0xff] }
 0xbff   :  { %2791 = vpow2.f32 %v2305_v12 }
 0xc07   :  { %v2790_v11 = vpop.eup %2789 }
 0xc08   :  { %653 = vrot.lane.b32.xlu0 %v2790_v11, %s2889_s28 }
 0xc09   :  { %v2792_v14 = vpop.eup %2791 }
 0xc0a   :  { %v643_v15 = vadd.f32 1.0, %v2792_v14 }
 0xc0c   :  { %2793 = vrcp.f32 %v643_v15 }
 0xc16   :  { %v2794_v16 = vpop.eup %2793 }
 0xc17   :  { %v651_v23 = vmul.f32 %v2794_v16, %v649_v20 }
 0xc7a   :  { %v654_v17 = vpop.permute.xlu0 %653 }
 0xc7b   :  { %v656_v18 = vmul.f32 %v2794_v16, %v654_v17 }
 0xc7d   :  { %658 = vrot.lane.b32.xlu0 %v656_v18, %s2890_s29 }
 0xcef   :  { %v659_v24 = vpop.permute.xlu0 %658 }
 0xcf0   :  { %v661_v25 = vadd.f32 %v659_v24, %v651_v23 }
 0xcf2   :  { %2795 = vtanh.f32 %v661_v25  ;;  %v683_v26 = vsel %vm673_vm11, %v661_v25, %v649_v20 }
 0xcf3   :  { %685 = vrot.lane.b32.xlu1 %v683_v26, %s2891_s7 }
 0xcfc   :  { %v2796_v27 = vpop.eup %2795 }
 0xcfd   :  { %664 = vrot.lane.b32.xlu0 %v2796_v27, %s2889_s28 }
 0xd65   :  { %v686_v30 = vpop.permute.xlu1 %685 }
 0xd66   :  { %688 = vst.msk [vmem:[#allocation3] sm:$0xff] %vm25_vm0, %v686_v30 }
 0xd6d   :  { %v697_v31 = vld [vmem:[#allocation3] sm:$0xff] }
 0xd6e   :  { %782 = vrot.lane.b32.xlu1 %v697_v31, %s2890_s29 }
 0xd6f   :  { %v665_v32 = vpop.permute.xlu0 %664 }
 0xd70   :  { %v3113_v36 = vmul.f32 %v2794_v16, %v665_v32 }
 0xd72   :  { %805 = vperm.xlu1 %2755, %v803_v35   ;;  %v677_v37 = vsel %vm673_vm11, %v3113_v36, %v675_v28 }
 0xd73   :  { %679 = vrot.lane.b32.xlu0 %v677_v37, %s2890_s29 }
 0xde0   :  { %v783_v49 = vpop.permute.xlu1 %782 }
 0xde5   :  { %v680_v38 = vpop.permute.xlu0 %679 }
 0xde6   :  { %682 = vst.msk [vmem:[#allocation2] sm:$0xff] %vm25_vm0, %v680_v38 }
 0xded   :  { %v696_v39 = vld [vmem:[#allocation2] sm:$0xff] }
 0xdee   :  { %808 = vrot.lane.b32.xlu1 %v696_v39, %s2891_s7  ;;  %2512 = vmatmul.mubr.msk.f32.vlgmr.msra.gmra.mrb[4].mxu1 %vm25_vm0, %v696_v39  ;;  %v1071_v39 = vsel %vm1070_vm2, 1, %v2888_v13  ;;  %v287_v13 = vsel %vm271_vm5, %v3021_v63, 0.0 }
 0xdef   :  { %2688 = vmatpush3.bf16.msra.mxu1 %v2938_v5  ;;  %2533 = vmatprep.mubr.msk.f32.mxu1 %vm2886_vm1, %v2887_v4 }
 0xdf0   :  { %2689 = vmatprep.subr.bf16.mxu1 %v2885_v0 }
 0xdf1   :  { %v3133_v51 = vpop.permute.xlu1 %805 }
 0xdf2   :  { %vm807_vm13 = vcmp.eq.s32.totalorder %v3133_v51, 1 }
 0xdf3   :  { %2691 = vmatpush3.bf16.msra.mxu1 %v2947_v7 }
 0xdf4   :  { %2700 = vmatprep.subr.bf16.mxu1 %v2885_v0 }
 0xe60   :  { %v809_v58 = vpop.permute.xlu1 %808 }
 0xec1   :  { %v769_v41 = vpop.f32.mrb[4].mxu1 }
 0xec2   :  { %v773_v42 = vadd.f32 %v2307_v40, %v769_v41  ;;  %v2513_v43 = vpop.f32.mrb[5].mxu1 }
 0xec4   :  { %2797 = vtanh.f32 %v773_v42  ;;  %v2309_v5 = vmul.f32 -1.442695, %v773_v42 }
 0xec6   :  { %2799 = vpow2.f32 %v2309_v5 }
 0xece   :  { %v2798_v44 = vpop.eup %2797 }
 0xecf   :  { %787 = vrot.lane.b32.xlu0 %v2798_v44, %s2889_s28 }
 0xed0   :  { %v2800_v45 = vpop.eup %2799 }
 0xed1   :  { %v777_v46 = vadd.f32 1.0, %v2800_v45 }
 0xed3   :  { %2801 = vrcp.f32 %v777_v46  ;;  %v2315_v46 = vld [vmem:[%s3591_s0 + $0x38] sm:$0xff] }
 0xedd   :  { %v2802_v47 = vpop.eup %2801 }
 0xede   :  { %v785_v53 = vmul.f32 %v2802_v47, %v783_v49 }
 0xf41   :  { %v788_v7 = vpop.permute.xlu0 %787 }
 0xf42   :  { %v790_v48 = vmul.f32 %v2802_v47, %v788_v7 }
 0xf44   :  { %792 = vrot.lane.b32.xlu0 %v790_v48, %s2890_s29 }
 0xfb6   :  { %v793_v54 = vpop.permute.xlu0 %792 }
 0xfb7   :  { %v795_v55 = vadd.f32 %v793_v54, %v785_v53 }
 0xfb9   :  { %2803 = vtanh.f32 %v795_v55  ;;  %v817_v56 = vsel %vm807_vm13, %v795_v55, %v783_v49 }
 0xfba   :  { %819 = vrot.lane.b32.xlu1 %v817_v56, %s2891_s7 }
 0xfc3   :  { %v2804_v57 = vpop.eup %2803 }
 0xfc4   :  { %798 = vrot.lane.b32.xlu0 %v2804_v57, %s2889_s28 }
0x102c   :  { %v820_v59 = vpop.permute.xlu1 %819 }
0x102d   :  { %822 = vst.msk [vmem:[#allocation3] sm:$0xff] %vm25_vm0, %v820_v59 }
0x1034   :  { %v831_v60 = vld [vmem:[#allocation3] sm:$0xff] }
0x1035   :  { %916 = vrot.lane.b32.xlu1 %v831_v60, %s2890_s29 }
0x1036   :  { %v799_v61 = vpop.permute.xlu0 %798 }
0x1037   :  { %v3144_v2 = vmul.f32 %v2802_v47, %v799_v61 }
0x1039   :  { %939 = vperm.xlu1 %2755, %v937_v1   ;;  %v811_v3 = vsel %vm807_vm13, %v3144_v2, %v809_v58  ;;  %v1106_v1 = vld [vmem:[%s3594_s2] sm:$0xff] }
0x103a   :  { %813 = vrot.lane.b32.xlu0 %v811_v3, %s2890_s29  ;;  %v1107_v3 = vld [vmem:[%s3594_s2 + $0x8] sm:$0xff] }
0x10a7   :  { %v917_v24 = vpop.permute.xlu1 %916 }
0x10ac   :  { %v814_v6 = vpop.permute.xlu0 %813 }
0x10ad   :  { %816 = vst.msk [vmem:[#allocation2] sm:$0xff] %vm25_vm0, %v814_v6  ;;  %v2692_v6 = vpack.c.bf16 %v1107_v3, %v1106_v1 }
0x10af   :  { %2693 = vmatprep.subr.bf16.mxu0 %v2692_v6 }
0x10b4   :  { %v830_v8 = vld [vmem:[#allocation2] sm:$0xff] }
0x10b5   :  { %942 = vrot.lane.b32.xlu1 %v830_v8, %s2891_s7  ;;  %2523 = vmatmul.mubr.msk.f32.vlgmr.msra.gmra.mrb[6].mxu0 %vm25_vm0, %v830_v8  ;;  %v1108_v8 = vld [vmem:[%s3594_s2 + $0x10] sm:$0xff] }
0x10b6   :  { %2695 = vmatpush3.bf16.msra.mxu0 %v2692_v6 }
0x10b8   :  { %v3158_v25 = vpop.permute.xlu1 %939 }
0x10b9   :  { %vm941_vm15 = vcmp.eq.s32.totalorder %v3158_v25, 1 }
0x1127   :  { %v943_v32 = vpop.permute.xlu1 %942 }
0x1188   :  { %v903_v10 = vpop.f32.mrb[6].mxu0 }
0x1189   :  { %v907_v11 = vadd.f32 %v2311_v9, %v903_v10  ;;  %v2524_v12 = vpop.f32.mrb[7].mxu0  ;;  %v1109_v9 = vld [vmem:[%s3594_s2 + $0x18] sm:$0xff] }
0x118a   :  { %v2696_v10 = vpack.c.bf16 %v1109_v9, %v1108_v8  ;;  %v154_v12 = vsel %vm138_vm3, %v2986_v33, 0.0  ;;  %v2331_v33 = vld [vmem:[%s3590_s3 + $0x30] sm:$0xff] }
0x118b   :  { %2805 = vtanh.f32 %v907_v11  ;;  %v2313_v15 = vmul.f32 -1.442695, %v907_v11 }
0x118c   :  { %2697 = vmatprep.subr.bf16.mxu0 %v2696_v10 }
0x118d   :  { %2807 = vpow2.f32 %v2313_v15  ;;  %2699 = vmatpush3.bf16.msra.mxu0 %v2696_v10  ;;  %v2329_v15 = vld [vmem:[%s3590_s3 + $0x20] sm:$0xff] }
0x118e   :  { %2712 = vmatprep.subr.bf16.mxu0 %v2885_v0 }
0x1195   :  { %v2806_v14 = vpop.eup %2805 }
0x1196   :  { %921 = vrot.lane.b32.xlu0 %v2806_v14, %s2889_s28 }
0x1197   :  { %v2808_v16 = vpop.eup %2807 }
0x1198   :  { %v911_v17 = vadd.f32 1.0, %v2808_v16  ;;  %v2330_v16 = vld [vmem:[%s3590_s3 + $0x28] sm:$0xff] }
0x119a   :  { %2809 = vrcp.f32 %v911_v17  ;;  %v3224_v17 = vpack.c.bf16 %v2330_v16, %v2329_v15 }
0x11a4   :  { %v2810_v18 = vpop.eup %2809 }
0x11a5   :  { %v919_v26 = vmul.f32 %v2810_v18, %v917_v24 }
0x1208   :  { %v922_v20 = vpop.permute.xlu0 %921 }
0x1209   :  { %v924_v23 = vmul.f32 %v2810_v18, %v922_v20 }
0x120b   :  { %926 = vrot.lane.b32.xlu0 %v924_v23, %s2890_s29 }
0x127d   :  { %v927_v27 = vpop.permute.xlu0 %926 }
0x127e   :  { %v929_v28 = vadd.f32 %v927_v27, %v919_v26 }
0x1280   :  { %2811 = vtanh.f32 %v929_v28  ;;  %v951_v30 = vsel %vm941_vm15, %v929_v28, %v917_v24 }
0x1281   :  { %953 = vrot.lane.b32.xlu1 %v951_v30, %s2891_s7 }
0x128a   :  { %v2812_v31 = vpop.eup %2811 }
0x128b   :  { %932 = vrot.lane.b32.xlu0 %v2812_v31, %s2889_s28 }
0x12f3   :  { %v954_v35 = vpop.permute.xlu1 %953 }
0x12f4   :  { %956 = vst.msk [vmem:[#allocation3] sm:$0xff] %vm25_vm0, %v954_v35 }
0x12fb   :  { %v965_v37 = vld [vmem:[#allocation3] sm:$0xff] }
0x12fc   :  { %1050 = vrot.lane.b32.xlu1 %v965_v37, %s2890_s29 }
0x12fd   :  { %v933_v38 = vpop.permute.xlu0 %932 }
0x12fe   :  { %v3169_v40 = vmul.f32 %v2810_v18, %v933_v38  ;;  %v2332_v18 = vld [vmem:[%s3590_s3 + $0x38] sm:$0xff] }
0x12ff   :  { %v3235_v20 = vpack.c.bf16 %v2332_v18, %v2331_v33 }
0x1300   :  { %1073 = vperm.xlu1 %2755, %v1071_v39   ;;  %v945_v41 = vsel %vm941_vm15, %v3169_v40, %v943_v32  ;;  %v3276_v39 = vld [vmem:[%s3595_s4 + $0x1] ss:$0 sm:$0xff] }
0x1301   :  { %947 = vrot.lane.b32.xlu0 %v945_v41, %s2890_s29 }
0x136e   :  { %v1051_v19 = vpop.permute.xlu1 %1050 }
0x1373   :  { %v948_v42 = vpop.permute.xlu0 %947 }
0x1374   :  { %950 = vst.msk [vmem:[#allocation2] sm:$0xff] %vm25_vm0, %v948_v42 }
0x137b   :  { %v964_v43 = vld [vmem:[#allocation2] sm:$0xff] }
0x137c   :  { %1076 = vrot.lane.b32.xlu1 %v964_v43, %s2891_s7  ;;  %2534 = vmatmul.mubr.msk.f32.vlgmr.msra.gmra.mrb[6].mxu1 %vm25_vm0, %v964_v43 }
0x137d   :  { %2564 = vmatprep.mubr.msk.f32.mxu1 %vm2886_vm1, %v2887_v4  ;;  %2702 = vmatpush3.bf16.msra.mxu1 %v3224_v17 }
0x137e   :  { %2703 = vmatprep.subr.bf16.mxu1 %v2885_v0 }
0x137f   :  { %v3184_v44 = vpop.permute.xlu1 %1073 }
0x1380   :  { %289 = vrot.lane.b32.xlu1 %v287_v13, %s2890_s29  ;;  %vm1075_vm4 = vcmp.eq.s32.totalorder %v3184_v44, 1 }
0x1381   :  { %2705 = vmatpush3.bf16.msra.mxu1 %v3235_v20 }
0x1382   :  { %2706 = vmatprep.subr.bf16.mxu1 %v2885_v0 }
0x13ee   :  { %v1077_v5 = vpop.permute.xlu1 %1076 }
0x13f2   :  { %v290_v45 = vpop.permute.xlu1 %289 }
0x13f3   :  { %2294 = vst.msk [vmem:[%s3593_s5 + $0x8] sm:$0xff] %vm25_vm0, %v290_v45 }
0x13fa   :  { %v1099_v30 = vld [vmem:[%s3593_s5 + $0x8] sm:$0xff] }
0x144f   :  { %v1037_v47 = vpop.f32.mrb[6].mxu1 }
0x1450   :  { %v1041_v7 = vadd.f32 %v2315_v46, %v1037_v47  ;;  %v2535_v48 = vpop.f32.mrb[7].mxu1 }
0x1452   :  { %2813 = vtanh.f32 %v1041_v7  ;;  %v2317_v49 = vmul.f32 -1.442695, %v1041_v7 }
0x1454   :  { %2815 = vpow2.f32 %v2317_v49 }
0x145c   :  { %v2814_v63 = vpop.eup %2813 }
0x145d   :  { %1055 = vrot.lane.b32.xlu0 %v2814_v63, %s2889_s28 }
0x145e   :  { %v2816_v53 = vpop.eup %2815 }
0x145f   :  { %v1045_v54 = vadd.f32 1.0, %v2816_v53 }
0x1461   :  { %2817 = vrcp.f32 %v1045_v54 }
0x146b   :  { %v2818_v55 = vpop.eup %2817 }
0x146c   :  { %v1053_v58 = vmul.f32 %v2818_v55, %v1051_v19 }
0x14cf   :  { %v1056_v56 = vpop.permute.xlu0 %1055 }
0x14d0   :  { %v1058_v57 = vmul.f32 %v2818_v55, %v1056_v56 }
0x14d2   :  { %1060 = vrot.lane.b32.xlu0 %v1058_v57, %s2890_s29 }
0x1544   :  { %v1061_v59 = vpop.permute.xlu0 %1060 }
0x1545   :  { %v1063_v60 = vadd.f32 %v1061_v59, %v1053_v58 }
0x1547   :  { %2819 = vtanh.f32 %v1063_v60  ;;  %v1085_v61 = vsel %vm1075_vm4, %v1063_v60, %v1051_v19 }
0x1548   :  { %1087 = vrot.lane.b32.xlu1 %v1085_v61, %s2891_s7 }
0x1551   :  { %v2820_v11 = vpop.eup %2819 }
0x1552   :  { %1066 = vrot.lane.b32.xlu0 %v2820_v11, %s2889_s28 }
0x1556   :  { %156 = vrot.lane.b32.xlu0 %v154_v12, %s2890_s29 }
0x15ba   :  { %v1088_v14 = vpop.permute.xlu1 %1087 }
0x15bb   :  { %1090 = vst.msk [vmem:[#allocation3] sm:$0xff] %vm25_vm0, %v1088_v14 }
0x15bc   :  { %1269 = vst.msk [vmem:[#allocation3] sm:$0xff] %vm25_vm0, %v2887_v4 }
0x15c3   :  { %v1271_v31 = vld [vmem:[#allocation3] sm:$0xff] }
0x15c4   :  { %v1067_v23 = vpop.permute.xlu0 %1066  ;;  %1355 = vrot.lane.b32.xlu1 %v1271_v31, %s2890_s29 }
0x15c5   :  { %v3240_v24 = vmul.f32 %v2818_v55, %v1067_v23 }
0x15c7   :  { %v1079_v26 = vsel %vm1075_vm4, %v3240_v24, %v1077_v5 }
0x15c8   :  { %1081 = vrot.lane.b32.xlu0 %v1079_v26, %s2890_s29  ;;  %v157_v27 = vpop.permute.xlu0 %156  ;;  %v555_v26 = vsel %vm539_vm9, %v3083_v62, 0.0 }
0x15c9   :  { %159 = vst.msk [vmem:[%s3593_s5] sm:$0xff] %vm25_vm0, %v157_v27  ;;  %v823_v27 = vsel %vm807_vm13, %v3144_v2, 0.0 }
0x15d0   :  { %v1098_v28 = vld [vmem:[%s3593_s5] sm:$0xff] }
0x15d1   :  { %2544 = vmatprep.mubr.msk.f32.mxu0 %vm25_vm0, %v1098_v28  ;;  %v1091_v28 = vsel %vm1075_vm4, %v3240_v24, 0.0 }
0x15d2   :  { %2545 = vmatmul.mubr.msk.f32.vlgmr.msra.gmra.mrb[8].mxu0 %vm25_vm0, %v1099_v30 }
0x15d3   :  { %2714 = vmatpush3.bf16.msra.mxu0 %v3224_v17 }
0x15d4   :  { %2715 = vmatprep.subr.bf16.mxu0 %v2885_v0 }
0x15d7   :  { %2717 = vmatpush3.bf16.msra.mxu0 %v3235_v20 }
0x15d8   :  { %2724 = vmatprep.subr.bf16.mxu0 %v2885_v0 }
0x1636   :  { %v1356_v63 = vpop.permute.xlu1 %1355 }
0x163a   :  { %v1082_v32 = vpop.permute.xlu0 %1081 }
0x163b   :  { %1084 = vst.msk [vmem:[#allocation2] sm:$0xff] %vm25_vm0, %v1082_v32 }
0x163c   :  { %1268 = vst.msk [vmem:[#allocation2] sm:$0xff] %vm25_vm0, %v2887_v4 }
0x1643   :  { %v1270_v35 = vld [vmem:[#allocation2] sm:$0xff] }
0x1644   :  { %2565 = vmatmul.mubr.msk.f32.vlgmr.msra.gmra.mrb[8].mxu1 %vm25_vm0, %v1270_v35 }
0x1645   :  { %2708 = vmatpush3.bf16.msra.mxu1 %v3224_v17  ;;  %2575 = vmatprep.mubr.msk.f32.mxu1 %vm2886_vm1, %v2887_v4 }
0x1646   :  { %2709 = vmatprep.subr.bf16.mxu1 %v2885_v0 }
0x1649   :  { %2711 = vmatpush3.bf16.msra.mxu1 %v3235_v20 }
0x164a   :  { %2718 = vmatprep.subr.bf16.mxu1 %v2885_v0 }
0x16a5   :  { %v2546_v37 = vpop.f32.mrb[8].mxu0 }
0x16a6   :  { %v1200_v38 = vpop.f32.mrb[9].mxu0  ;;  %v1248_v8 = vadd.f32 %v2546_v37, %v3276_v39 }
0x16a7   :  { %v1247_v41 = vadd.f32 %v3276_v39, %v1200_v38 }
0x1717   :  { %v1342_v42 = vpop.f32.mrb[8].mxu1 }
0x1718   :  { %v1346_v43 = vadd.f32 %v1342_v42, %v1247_v41  ;;  %v2566_v13 = vpop.f32.mrb[9].mxu1  ;;  %v421_v42 = vsel %vm405_vm7, %v3052_v34, 0.0 }
0x1719   :  { %v957_v13 = vsel %vm941_vm15, %v3169_v40, 0.0 }
0x171a   :  { %2821 = vtanh.f32 %v1346_v43  ;;  %v2334_v5 = vmul.f32 -1.442695, %v1346_v43  ;;  %v689_v43 = vsel %vm673_vm11, %v3113_v36, 0.0 }
0x171c   :  { %2823 = vpow2.f32 %v2334_v5 }
0x1724   :  { %v2822_v19 = vpop.eup %2821 }
0x1725   :  { %1360 = vrot.lane.b32.xlu0 %v2822_v19, %s2889_s28 }
0x1726   :  { %v2824_v45 = vpop.eup %2823 }
0x1727   :  { %v1350_v46 = vadd.f32 1.0, %v2824_v45 }
0x1729   :  { %2825 = vrcp.f32 %v1350_v46 }
0x1733   :  { %v2826_v47 = vpop.eup %2825 }
0x1734   :  { %v1358_v49 = vmul.f32 %v2826_v47, %v1356_v63 }
0x1797   :  { %v1361_v7 = vpop.permute.xlu0 %1360 }
0x1798   :  { %v1363_v48 = vmul.f32 %v2826_v47, %v1361_v7 }
0x179a   :  { %1365 = vrot.lane.b32.xlu0 %v1363_v48, %s2890_s29 }
0x179e   :  { %1375 = vrot.lane.b32.xlu0 %v1270_v35, %s2891_s7 }
0x180c   :  { %v1366_v53 = vpop.permute.xlu0 %1365 }
0x180d   :  { %v1368_v54 = vadd.f32 %v1366_v53, %v1358_v49 }
0x180f   :  { %2827 = vtanh.f32 %v1368_v54  ;;  %v1384_v55 = vsel %vm138_vm3, %v1368_v54, %v1356_v63 }
0x1810   :  { %1386 = vrot.lane.b32.xlu0 %v1384_v55, %s2891_s7  ;;  %v1376_v57 = vpop.permute.xlu0 %1375 }
0x1819   :  { %v2828_v56 = vpop.eup %2827 }
0x181a   :  { %1371 = vrot.lane.b32.xlu1 %v2828_v56, %s2889_s28 }
0x1882   :  { %v1387_v58 = vpop.permute.xlu0 %1386 }
0x1883   :  { %1389 = vst.msk [vmem:[#allocation3] sm:$0xff] %vm25_vm0, %v1387_v58 }
0x188a   :  { %v1397_v59 = vld [vmem:[#allocation3] sm:$0xff] }
0x188b   :  { %1482 = vrot.lane.b32.xlu0 %v1397_v59, %s2890_s29 }
0x188c   :  { %v1372_v60 = vpop.permute.xlu1 %1371 }
0x188d   :  { %v3288_v61 = vmul.f32 %v2826_v47, %v1372_v60 }
0x188f   :  { %v1378_v1 = vsel %vm138_vm3, %v3288_v61, %v1376_v57 }
0x1890   :  { %1380 = vrot.lane.b32.xlu1 %v1378_v1, %s2890_s29 }
0x18fd   :  { %v1483_v30 = vpop.permute.xlu0 %1482 }
0x1902   :  { %v1381_v3 = vpop.permute.xlu1 %1380 }
0x1903   :  { %1383 = vst.msk [vmem:[#allocation2] sm:$0xff] %vm25_vm0, %v1381_v3 }
0x190a   :  { %v1396_v6 = vld [vmem:[#allocation2] sm:$0xff] }
0x190b   :  { %2576 = vmatmul.mubr.msk.f32.vlgmr.msra.gmra.mrb[10].mxu1 %vm25_vm0, %v1396_v6 }
0x190c   :  { %2720 = vmatpush3.bf16.msra.mxu1 %v3224_v17  ;;  %2597 = vmatprep.mubr.msk.f32.mxu1 %vm2886_vm1, %v2887_v4 }
0x190d   :  { %2721 = vmatprep.subr.bf16.mxu1 %v2885_v0 }
0x1910   :  { %2723 = vmatpush3.bf16.msra.mxu1 %v3235_v20 }
0x1911   :  { %2730 = vmatprep.subr.bf16.mxu1 %v2885_v0 }
0x19de   :  { %v1469_v9 = vpop.f32.mrb[10].mxu1 }
0x19df   :  { %v1473_v10 = vadd.f32 %v1469_v9, %v1248_v8  ;;  %v2577_v11 = vpop.f32.mrb[11].mxu1 }
0x19e1   :  { %2829 = vtanh.f32 %v1473_v10  ;;  %v2336_v14 = vmul.f32 -1.442695, %v1473_v10 }
0x19e3   :  { %2831 = vpow2.f32 %v2336_v14 }
0x19eb   :  { %v2830_v12 = vpop.eup %2829 }
0x19ec   :  { %1487 = vrot.lane.b32.xlu1 %v2830_v12, %s2889_s28 }
0x19ed   :  { %v2832_v15 = vpop.eup %2831 }
0x19ee   :  { %v1477_v16 = vadd.f32 1.0, %v2832_v15 }
0x19f0   :  { %2833 = vrcp.f32 %v1477_v16 }
0x19fa   :  { %v2834_v33 = vpop.eup %2833 }
0x19fb   :  { %v1485_v31 = vmul.f32 %v2834_v33, %v1483_v30 }
0x1a5e   :  { %v1488_v18 = vpop.permute.xlu1 %1487 }
0x1a5f   :  { %v1490_v23 = vmul.f32 %v2834_v33, %v1488_v18 }
0x1a61   :  { %1492 = vrot.lane.b32.xlu1 %v1490_v23, %s2890_s29 }
0x1a65   :  { %1502 = vrot.lane.b32.xlu1 %v1396_v6, %s2891_s7 }
0x1a69   :  { %557 = vrot.lane.b32.xlu1 %v555_v26, %s2890_s29 }
0x1a6d   :  { %825 = vrot.lane.b32.xlu1 %v823_v27, %s2890_s29 }
0x1a71   :  { %1093 = vrot.lane.b32.xlu1 %v1091_v28, %s2890_s29 }
0x1ad3   :  { %v1493_v32 = vpop.permute.xlu1 %1492 }
0x1ad4   :  { %v1495_v35 = vadd.f32 %v1493_v32, %v1485_v31 }
0x1ad6   :  { %2835 = vtanh.f32 %v1495_v35  ;;  %v1511_v62 = vsel %vm271_vm5, %v1495_v35, %v1483_v30 }
0x1ad7   :  { %v1503_v37 = vpop.permute.xlu1 %1502  ;;  %1513 = vrot.lane.b32.xlu1 %v1511_v62, %s2891_s7 }
0x1adb   :  { %v558_v2 = vpop.permute.xlu1 %557 }
0x1adc   :  { %2302 = vst.msk [vmem:[%s3593_s5 + $0x18] sm:$0xff] %vm25_vm0, %v558_v2 }
0x1adf   :  { %v826_v24 = vpop.permute.xlu1 %825 }
0x1ae0   :  { %v2836_v38 = vpop.eup %2835  ;;  %2310 = vst.msk [vmem:[%s3593_s5 + $0x28] sm:$0xff] %vm25_vm0, %v826_v24 }
0x1ae1   :  { %1498 = vrot.lane.b32.xlu0 %v2836_v38, %s2889_s28 }
0x1ae3   :  { %v1094_v41 = vpop.permute.xlu1 %1093  ;;  %v1101_v48 = vld [vmem:[%s3593_s5 + $0x18] sm:$0xff] }
0x1ae4   :  { %2318 = vst.msk [vmem:[%s3593_s5 + $0x38] sm:$0xff] %vm25_vm0, %v1094_v41 }
0x1ae5   :  { %423 = vrot.lane.b32.xlu0 %v421_v42, %s2890_s29 }
0x1ae7   :  { %v1103_v49 = vld [vmem:[%s3593_s5 + $0x28] sm:$0xff] }
0x1ae9   :  { %691 = vrot.lane.b32.xlu0 %v689_v43, %s2890_s29 }
0x1aeb   :  { %v1105_v54 = vld [vmem:[%s3593_s5 + $0x38] sm:$0xff] }
0x1aed   :  { %959 = vrot.lane.b32.xlu0 %v957_v13, %s2890_s29 }
0x1b49   :  { %v1514_v19 = vpop.permute.xlu1 %1513 }
0x1b4a   :  { %1516 = vst.msk [vmem:[#allocation3] sm:$0xff] %vm25_vm0, %v1514_v19 }
0x1b51   :  { %v1524_v5 = vld [vmem:[#allocation3] sm:$0xff] }
0x1b52   :  { %1609 = vrot.lane.b32.xlu1 %v1524_v5, %s2890_s29 }
0x1b53   :  { %v1499_v34 = vpop.permute.xlu0 %1498 }
0x1b54   :  { %v3348_v45 = vmul.f32 %v2834_v33, %v1499_v34 }
0x1b56   :  { %v1505_v36 = vsel %vm271_vm5, %v3348_v45, %v1503_v37 }
0x1b57   :  { %1507 = vrot.lane.b32.xlu0 %v1505_v36, %s2890_s29  ;;  %v424_v46 = vpop.permute.xlu0 %423 }
0x1b58   :  { %2298 = vst.msk [vmem:[%s3593_s5 + $0x10] sm:$0xff] %vm25_vm0, %v424_v46 }
0x1b5b   :  { %v692_v40 = vpop.permute.xlu0 %691 }
0x1b5c   :  { %2306 = vst.msk [vmem:[%s3593_s5 + $0x20] sm:$0xff] %vm25_vm0, %v692_v40 }
0x1b5f   :  { %v960_v47 = vpop.permute.xlu0 %959  ;;  %v1100_v7 = vld [vmem:[%s3593_s5 + $0x10] sm:$0xff] }
0x1b60   :  { %2314 = vst.msk [vmem:[%s3593_s5 + $0x30] sm:$0xff] %vm25_vm0, %v960_v47  ;;  %2547 = vmatprep.mubr.msk.f32.mxu0 %vm25_vm0, %v1100_v7 }
0x1b61   :  { %2548 = vmatmul.mubr.msk.f32.gmra.mrb[10].mxu0 %vm25_vm0, %v1101_v48 }
0x1b63   :  { %v1102_v63 = vld [vmem:[%s3593_s5 + $0x20] sm:$0xff] }
0x1b64   :  { %2550 = vmatprep.mubr.msk.f32.mxu0 %vm25_vm0, %v1102_v63 }
0x1b65   :  { %2551 = vmatmul.mubr.msk.f32.gmra.mrb[12].mxu0 %vm25_vm0, %v1103_v49 }
0x1b67   :  { %v1104_v53 = vld [vmem:[%s3593_s5 + $0x30] sm:$0xff] }
0x1b68   :  { %2553 = vmatprep.mubr.msk.f32.mxu0 %vm25_vm0, %v1104_v53 }
0x1b69   :  { %2554 = vmatmul.mubr.msk.f32.gmra.mrb[14].mxu0 %vm25_vm0, %v1105_v54 }
0x1b6a   :  { %2586 = vmatprep.mubr.msk.f32.mxu0 %vm2886_vm1, %v2887_v4 }
0x1bc4   :  { %v1610_v23 = vpop.permute.xlu1 %1609 }
0x1bc9   :  { %v1508_v55 = vpop.permute.xlu0 %1507 }
0x1bca   :  { %1510 = vst.msk [vmem:[#allocation2] sm:$0xff] %vm25_vm0, %v1508_v55 }
0x1bd1   :  { %v1523_v56 = vld [vmem:[#allocation2] sm:$0xff] }
0x1bd2   :  { %2587 = vmatmul.mubr.msk.f32.vlgmr.msra.gmra.mrb[16].mxu0 %vm25_vm0, %v1523_v56 }
0x1bd3   :  { %2726 = vmatpush3.bf16.msra.mxu0 %v3224_v17  ;;  %2608 = vmatprep.mubr.msk.f32.mxu0 %vm2886_vm1, %v2887_v4 }
0x1bd4   :  { %2727 = vmatprep.subr.bf16.mxu0 %v2885_v0 }
0x1bd7   :  { %2729 = vmatpush3.bf16.msra.mxu0 %v3235_v20 }
0x1bd8   :  { %2736 = vmatprep.subr.bf16.mxu0 %v2885_v0 }
0x1c34   :  { %v2549_v57 = vpop.f32.mrb[10].mxu0 }
0x1c35   :  { %v1210_v58 = vpop.f32.mrb[11].mxu0  ;;  %v1250_v42 = vadd.f32 %v2549_v57, %v3276_v39 }
0x1c36   :  { %v1249_v6 = vadd.f32 %v3276_v39, %v1210_v58 }
0x1c38   :  { %v3400_v59 = vpop.f32.mrb[12].mxu0 }
0x1c39   :  { %v3402_v60 = vpop.f32.mrb[13].mxu0 }
0x1c3c   :  { %v3404_v1 = vpop.f32.mrb[14].mxu0 }
0x1c3d   :  { %v3406_v3 = vpop.f32.mrb[15].mxu0 }
0x1ca5   :  { %v1596_v8 = vpop.f32.mrb[16].mxu0 }
0x1ca6   :  { %v1600_v9 = vadd.f32 %v1596_v8, %v1249_v6  ;;  %v2588_v10 = vpop.f32.mrb[17].mxu0 }
0x1ca8   :  { %2837 = vtanh.f32 %v1600_v9  ;;  %v2339_v12 = vmul.f32 -1.442695, %v1600_v9 }
0x1caa   :  { %2839 = vpow2.f32 %v2339_v12  ;;  %v1251_v12 = vadd.f32 %v3276_v39, %v3402_v60 }
0x1cb2   :  { %v2838_v11 = vpop.eup %2837 }
0x1cb3   :  { %1614 = vrot.lane.b32.xlu0 %v2838_v11, %s2889_s28 }
0x1cb4   :  { %v2840_v14 = vpop.eup %2839 }
0x1cb5   :  { %v1604_v15 = vadd.f32 1.0, %v2840_v14 }
0x1cb7   :  { %2841 = vrcp.f32 %v1604_v15 }
0x1cc1   :  { %v2842_v16 = vpop.eup %2841 }
0x1cc2   :  { %v1612_v26 = vmul.f32 %v2842_v16, %v1610_v23 }
0x1d25   :  { %v1615_v33 = vpop.permute.xlu0 %1614 }
0x1d26   :  { %v1617_v18 = vmul.f32 %v2842_v16, %v1615_v33 }
0x1d28   :  { %1619 = vrot.lane.b32.xlu0 %v1617_v18, %s2890_s29 }
0x1d2c   :  { %1629 = vrot.lane.b32.xlu0 %v1523_v56, %s2891_s7 }
0x1d9a   :  { %v1620_v27 = vpop.permute.xlu0 %1619 }
0x1d9b   :  { %v1622_v28 = vadd.f32 %v1620_v27, %v1612_v26 }
0x1d9d   :  { %2843 = vtanh.f32 %v1622_v28  ;;  %v1638_v30 = vsel %vm405_vm7, %v1622_v28, %v1610_v23 }
0x1d9e   :  { %1640 = vrot.lane.b32.xlu0 %v1638_v30, %s2891_s7  ;;  %v1630_v32 = vpop.permute.xlu0 %1629 }
0x1da7   :  { %v2844_v31 = vpop.eup %2843 }
0x1da8   :  { %1625 = vrot.lane.b32.xlu1 %v2844_v31, %s2889_s28 }
0x1e10   :  { %v1641_v35 = vpop.permute.xlu0 %1640 }
0x1e11   :  { %1643 = vst.msk [vmem:[#allocation3] sm:$0xff] %vm25_vm0, %v1641_v35 }
0x1e18   :  { %v1651_v62 = vld [vmem:[#allocation3] sm:$0xff] }
0x1e19   :  { %1736 = vrot.lane.b32.xlu0 %v1651_v62, %s2890_s29 }
0x1e1a   :  { %v1626_v37 = vpop.permute.xlu1 %1625 }
0x1e1b   :  { %v3418_v2 = vmul.f32 %v2842_v16, %v1626_v37 }
0x1e1d   :  { %v1632_v24 = vsel %vm405_vm7, %v3418_v2, %v1630_v32 }
0x1e1e   :  { %1634 = vrot.lane.b32.xlu1 %v1632_v24, %s2890_s29 }
0x1e8b   :  { %v1737_v48 = vpop.permute.xlu0 %1736 }
0x1e90   :  { %v1635_v38 = vpop.permute.xlu1 %1634 }
0x1e91   :  { %1637 = vst.msk [vmem:[#allocation2] sm:$0xff] %vm25_vm0, %v1635_v38 }
0x1e98   :  { %v1650_v41 = vld [vmem:[#allocation2] sm:$0xff] }
0x1e99   :  { %2598 = vmatmul.mubr.msk.f32.vlgmr.msra.gmra.mrb[12].mxu1 %vm25_vm0, %v1650_v41 }
0x1e9a   :  { %2732 = vmatpush3.bf16.msra.mxu1 %v3224_v17  ;;  %2619 = vmatprep.mubr.msk.f32.mxu1 %vm2886_vm1, %v2887_v4 }
0x1e9b   :  { %2733 = vmatprep.subr.bf16.mxu1 %v2885_v0 }
0x1e9e   :  { %2735 = vmatpush3.bf16.msra.mxu1 %v3235_v20 }
0x1e9f   :  { %2742 = vmatprep.subr.bf16.mxu1 %v2885_v0 }
0x1f6c   :  { %v1723_v43 = vpop.f32.mrb[12].mxu1 }
0x1f6d   :  { %v1727_v13 = vadd.f32 %v1723_v43, %v1250_v42  ;;  %v2599_v19 = vpop.f32.mrb[13].mxu1 }
0x1f6f   :  { %2845 = vtanh.f32 %v1727_v13  ;;  %v2342_v34 = vmul.f32 -1.442695, %v1727_v13 }
0x1f71   :  { %2847 = vpow2.f32 %v2342_v34  ;;  %v1252_v34 = vadd.f32 %v3400_v59, %v3276_v39 }
0x1f79   :  { %v2846_v5 = vpop.eup %2845 }
0x1f7a   :  { %1741 = vrot.lane.b32.xlu1 %v2846_v5, %s2889_s28 }
0x1f7b   :  { %v2848_v36 = vpop.eup %2847 }
0x1f7c   :  { %v1731_v46 = vadd.f32 1.0, %v2848_v36 }
0x1f7e   :  { %2849 = vrcp.f32 %v1731_v46 }
0x1f88   :  { %v2850_v40 = vpop.eup %2849 }
0x1f89   :  { %v1739_v63 = vmul.f32 %v2850_v40, %v1737_v48 }
0x1fec   :  { %v1742_v47 = vpop.permute.xlu1 %1741 }
0x1fed   :  { %v1744_v7 = vmul.f32 %v2850_v40, %v1742_v47 }
0x1fef   :  { %1746 = vrot.lane.b32.xlu1 %v1744_v7, %s2890_s29 }
0x1ff3   :  { %1756 = vrot.lane.b32.xlu1 %v1650_v41, %s2891_s7 }
0x2061   :  { %v1747_v49 = vpop.permute.xlu1 %1746 }
0x2062   :  { %v1749_v53 = vadd.f32 %v1747_v49, %v1739_v63 }
0x2064   :  { %2851 = vtanh.f32 %v1749_v53  ;;  %v1765_v54 = vsel %vm539_vm9, %v1749_v53, %v1737_v48 }
0x2065   :  { %1767 = vrot.lane.b32.xlu1 %v1765_v54, %s2891_s7  ;;  %v1757_v56 = vpop.permute.xlu1 %1756 }
0x206e   :  { %v2852_v55 = vpop.eup %2851 }
0x206f   :  { %1752 = vrot.lane.b32.xlu0 %v2852_v55, %s2889_s28 }
0x20d7   :  { %v1768_v57 = vpop.permute.xlu1 %1767 }
0x20d8   :  { %1770 = vst.msk [vmem:[#allocation3] sm:$0xff] %vm25_vm0, %v1768_v57 }
0x20df   :  { %v1778_v58 = vld [vmem:[#allocation3] sm:$0xff] }
0x20e0   :  { %1863 = vrot.lane.b32.xlu1 %v1778_v58, %s2890_s29 }
0x20e1   :  { %v1753_v6 = vpop.permute.xlu0 %1752 }
0x20e2   :  { %v3442_v8 = vmul.f32 %v2850_v40, %v1753_v6 }
0x20e4   :  { %v1759_v9 = vsel %vm539_vm9, %v3442_v8, %v1757_v56 }
0x20e5   :  { %1761 = vrot.lane.b32.xlu0 %v1759_v9, %s2890_s29 }
0x2152   :  { %v1864_v60 = vpop.permute.xlu1 %1863 }
0x2157   :  { %v1762_v10 = vpop.permute.xlu0 %1761 }
0x2158   :  { %1764 = vst.msk [vmem:[#allocation2] sm:$0xff] %vm25_vm0, %v1762_v10 }
0x215f   :  { %v1777_v11 = vld [vmem:[#allocation2] sm:$0xff] }
0x2160   :  { %2609 = vmatmul.mubr.msk.f32.vlgmr.msra.gmra.mrb[18].mxu0 %vm25_vm0, %v1777_v11 }
0x2161   :  { %2738 = vmatpush3.bf16.msra.mxu0 %v3224_v17  ;;  %2630 = vmatprep.mubr.msk.f32.mxu0 %vm2886_vm1, %v2887_v4 }
0x2162   :  { %2739 = vmatprep.subr.bf16.mxu0 %v2885_v0 }
0x2165   :  { %2741 = vmatpush3.bf16.msra.mxu0 %v3235_v20 }
0x2233   :  { %v1850_v14 = vpop.f32.mrb[18].mxu0 }
0x2234   :  { %v1854_v15 = vadd.f32 %v1850_v14, %v1251_v12  ;;  %v2610_v16 = vpop.f32.mrb[19].mxu0  ;;  %v1253_v14 = vadd.f32 %v3276_v39, %v3406_v3 }
0x2236   :  { %2853 = vtanh.f32 %v1854_v15  ;;  %v2345_v18 = vmul.f32 -1.442695, %v1854_v15 }
0x2238   :  { %2855 = vpow2.f32 %v2345_v18 }
0x2240   :  { %v2854_v33 = vpop.eup %2853 }
0x2241   :  { %1868 = vrot.lane.b32.xlu0 %v2854_v33, %s2889_s28 }
0x2242   :  { %v2856_v23 = vpop.eup %2855 }
0x2243   :  { %v1858_v26 = vadd.f32 1.0, %v2856_v23 }
0x2245   :  { %2857 = vrcp.f32 %v1858_v26 }
0x224f   :  { %v2858_v27 = vpop.eup %2857 }
0x2250   :  { %v1866_v31 = vmul.f32 %v2858_v27, %v1864_v60 }
0x22b3   :  { %v1869_v28 = vpop.permute.xlu0 %1868 }
0x22b4   :  { %v1871_v30 = vmul.f32 %v2858_v27, %v1869_v28 }
0x22b6   :  { %1873 = vrot.lane.b32.xlu0 %v1871_v30, %s2890_s29 }
0x22ba   :  { %1883 = vrot.lane.b32.xlu0 %v1777_v11, %s2891_s7 }
0x2328   :  { %v1874_v32 = vpop.permute.xlu0 %1873 }
0x2329   :  { %v1876_v35 = vadd.f32 %v1874_v32, %v1866_v31 }
0x232b   :  { %2859 = vtanh.f32 %v1876_v35  ;;  %v1892_v62 = vsel %vm673_vm11, %v1876_v35, %v1864_v60 }
0x232c   :  { %1894 = vrot.lane.b32.xlu0 %v1892_v62, %s2891_s7  ;;  %v1884_v24 = vpop.permute.xlu0 %1883 }
0x2335   :  { %v2860_v37 = vpop.eup %2859 }
0x2336   :  { %1879 = vrot.lane.b32.xlu1 %v2860_v37, %s2889_s28 }
0x239e   :  { %v1895_v38 = vpop.permute.xlu0 %1894 }
0x239f   :  { %1897 = vst.msk [vmem:[#allocation3] sm:$0xff] %vm25_vm0, %v1895_v38 }
0x23a6   :  { %v1905_v41 = vld [vmem:[#allocation3] sm:$0xff] }
0x23a7   :  { %1990 = vrot.lane.b32.xlu0 %v1905_v41, %s2890_s29 }
0x23a8   :  { %v1880_v42 = vpop.permute.xlu1 %1879 }
0x23a9   :  { %v3466_v43 = vmul.f32 %v2858_v27, %v1880_v42 }
0x23ab   :  { %v1886_v13 = vsel %vm673_vm11, %v3466_v43, %v1884_v24 }
0x23ac   :  { %1888 = vrot.lane.b32.xlu1 %v1886_v13, %s2890_s29 }
0x241e   :  { %v1889_v19 = vpop.permute.xlu1 %1888 }
0x241f   :  { %1891 = vst.msk [vmem:[#allocation2] sm:$0xff] %vm25_vm0, %v1889_v19 }
0x2426   :  { %v1904_v5 = vld [vmem:[#allocation2] sm:$0xff] }
0x2427   :  { %2620 = vmatmul.mubr.msk.f32.vlgmr.msra.gmra.mrb[14].mxu1 %vm25_vm0, %v1904_v5 }
0x2428   :  { %2744 = vmatpush3.bf16.msra.mxu1 %v3224_v17  ;;  %2641 = vmatprep.mubr.msk.f32.mxu1 %vm2886_vm1, %v2887_v4 }
0x2429   :  { %2745 = vmatprep.subr.bf16.mxu1 %v2885_v0 }
0x242c   :  { %2747 = vmatpush3.bf16.msra.mxu1 %v3235_v20  ;;  %v1991_v20 = vpop.permute.xlu0 %1990 }
0x24fa   :  { %v1977_v36 = vpop.f32.mrb[14].mxu1 }
0x24fb   :  { %v1981_v46 = vadd.f32 %v1977_v36, %v1252_v34  ;;  %v2621_v40 = vpop.f32.mrb[15].mxu1  ;;  %v1254_v36 = vadd.f32 %v3404_v1, %v3276_v39  ;;  %v1517_v39 = vsel %vm271_vm5, %v3348_v45, 0.0  ;;  %v1771_v1 = vsel %vm539_vm9, %v3442_v8, 0.0 }
0x24fd   :  { %2861 = vtanh.f32 %v1981_v46  ;;  %v2348_v7 = vmul.f32 -1.442695, %v1981_v46 }
0x24ff   :  { %2863 = vpow2.f32 %v2348_v7 }
0x2507   :  { %v2862_v47 = vpop.eup %2861 }
0x2508   :  { %1995 = vrot.lane.b32.xlu1 %v2862_v47, %s2889_s28 }
0x2509   :  { %v2864_v17 = vpop.eup %2863 }
0x250a   :  { %v1985_v48 = vadd.f32 1.0, %v2864_v17 }
0x250c   :  { %2865 = vrcp.f32 %v1985_v48 }
0x2516   :  { %v2866_v4 = vpop.eup %2865 }
0x2517   :  { %v1993_v59 = vmul.f32 %v2866_v4, %v1991_v20 }
0x257a   :  { %v1996_v63 = vpop.permute.xlu1 %1995 }
0x257b   :  { %v1998_v0 = vmul.f32 %v2866_v4, %v1996_v63 }
0x257d   :  { %2000 = vrot.lane.b32.xlu1 %v1998_v0, %s2890_s29 }
0x2581   :  { %2010 = vrot.lane.b32.xlu1 %v1904_v5, %s2891_s7 }
0x25ef   :  { %v2001_v49 = vpop.permute.xlu1 %2000 }
0x25f0   :  { %v2003_v53 = vadd.f32 %v2001_v49, %v1993_v59 }
0x25f2   :  { %2867 = vtanh.f32 %v2003_v53  ;;  %v2019_v54 = vsel %vm807_vm13, %v2003_v53, %v1991_v20 }
0x25f3   :  { %2021 = vrot.lane.b32.xlu1 %v2019_v54, %s2891_s7  ;;  %v2011_v56 = vpop.permute.xlu1 %2010 }
0x25fc   :  { %v2868_v55 = vpop.eup %2867 }
0x25fd   :  { %2006 = vrot.lane.b32.xlu0 %v2868_v55, %s2889_s28 }
0x2665   :  { %v2022_v57 = vpop.permute.xlu1 %2021 }
0x2666   :  { %2024 = vst.msk [vmem:[#allocation3] sm:$0xff] %vm25_vm0, %v2022_v57  ;;  %v1644_v57 = vsel %vm405_vm7, %v3418_v2, 0.0 }
0x266d   :  { %v2032_v58 = vld [vmem:[#allocation3] sm:$0xff] }
0x266e   :  { %2117 = vrot.lane.b32.xlu1 %v2032_v58, %s2890_s29  ;;  %v1898_v58 = vsel %vm673_vm11, %v3466_v43, 0.0 }
0x266f   :  { %v2007_v6 = vpop.permute.xlu0 %2006 }
0x2670   :  { %v3490_v9 = vmul.f32 %v2866_v4, %v2007_v6 }
0x2672   :  { %v2013_v10 = vsel %vm807_vm13, %v3490_v9, %v2011_v56  ;;  %v2025_v59 = vsel %vm807_vm13, %v3490_v9, 0.0  ;;  %v1390_v56 = vsel %vm138_vm3, %v3288_v61, 0.0 }
0x2673   :  { %2015 = vrot.lane.b32.xlu0 %v2013_v10, %s2890_s29 }
0x26e0   :  { %v2118_v3 = vpop.permute.xlu1 %2117 }
0x26e5   :  { %v2016_v11 = vpop.permute.xlu0 %2015 }
0x26e6   :  { %2018 = vst.msk [vmem:[#allocation2] sm:$0xff] %vm25_vm0, %v2016_v11 }
0x26ed   :  { %v2031_v12 = vld [vmem:[#allocation2] sm:$0xff] }
0x26ee   :  { %2631 = vmatmul.mubr.msk.f32.vlgmr.msra.gmra.mrb[20].mxu0 %vm25_vm0, %v2031_v12 }
0x27c1   :  { %v2104_v15 = vpop.f32.mrb[20].mxu0 }
0x27c2   :  { %v2108_v16 = vadd.f32 %v2104_v15, %v1253_v14  ;;  %v2632_v33 = vpop.f32.mrb[21].mxu0 }
0x27c4   :  { %2869 = vtanh.f32 %v2108_v16  ;;  %v2351_v23 = vmul.f32 -1.442695, %v2108_v16 }
0x27c6   :  { %2871 = vpow2.f32 %v2351_v23 }
0x27ce   :  { %v2870_v18 = vpop.eup %2869 }
0x27cf   :  { %2122 = vrot.lane.b32.xlu0 %v2870_v18, %s2889_s28 }
0x27d0   :  { %v2872_v26 = vpop.eup %2871 }
0x27d1   :  { %v2112_v27 = vadd.f32 1.0, %v2872_v26 }
0x27d3   :  { %2873 = vrcp.f32 %v2112_v27 }
0x27dd   :  { %v2874_v28 = vpop.eup %2873 }
0x27de   :  { %v2120_v31 = vmul.f32 %v2874_v28, %v2118_v3 }
0x2841   :  { %v2123_v30 = vpop.permute.xlu0 %2122 }
0x2842   :  { %v2125_v60 = vmul.f32 %v2874_v28, %v2123_v30 }
0x2844   :  { %2127 = vrot.lane.b32.xlu0 %v2125_v60, %s2890_s29 }
0x2848   :  { %2137 = vrot.lane.b32.xlu0 %v2031_v12, %s2891_s7 }
0x28b6   :  { %v2128_v32 = vpop.permute.xlu0 %2127 }
0x28b7   :  { %v2130_v35 = vadd.f32 %v2128_v32, %v2120_v31 }
0x28b9   :  { %2875 = vtanh.f32 %v2130_v35  ;;  %v2146_v62 = vsel %vm941_vm15, %v2130_v35, %v2118_v3 }
0x28ba   :  { %2148 = vrot.lane.b32.xlu0 %v2146_v62, %s2891_s7  ;;  %v2138_v24 = vpop.permute.xlu0 %2137 }
0x28c3   :  { %v2876_v37 = vpop.eup %2875 }
0x28c4   :  { %2133 = vrot.lane.b32.xlu1 %v2876_v37, %s2889_s28 }
0x292c   :  { %v2149_v38 = vpop.permute.xlu0 %2148 }
0x292d   :  { %2151 = vst.msk [vmem:[#allocation3] sm:$0xff] %vm25_vm0, %v2149_v38 }
0x2934   :  { %v2159_v41 = vld [vmem:[#allocation3] sm:$0xff] }
0x2935   :  { %2244 = vrot.lane.b32.xlu0 %v2159_v41, %s2890_s29 }
0x2936   :  { %v2134_v42 = vpop.permute.xlu1 %2133 }
0x2937   :  { %v2136_v13 = vmul.f32 %v2874_v28, %v2134_v42 }
0x2939   :  { %v2140_v19 = vsel %vm941_vm15, %v2136_v13, %v2138_v24  ;;  %v2152_v29 = vsel %vm941_vm15, %v2136_v13, 0.0 }
0x293a   :  { %2142 = vrot.lane.b32.xlu1 %v2140_v19, %s2890_s29 }
0x29a7   :  { %v2245_v49 = vpop.permute.xlu0 %2244 }
0x29ac   :  { %v2143_v5 = vpop.permute.xlu1 %2142 }
0x29ad   :  { %2145 = vst.msk [vmem:[#allocation2] sm:$0xff] %vm25_vm0, %v2143_v5 }
0x29b4   :  { %v2158_v34 = vld [vmem:[#allocation2] sm:$0xff] }
0x29b5   :  { %2642 = vmatmul.mubr.msk.f32.vlgmr.msra.gmra.mrb[16].mxu1 %vm25_vm0, %v2158_v34 }
0x2a88   :  { %v2231_v46 = vpop.f32.mrb[16].mxu1 }
0x2a89   :  { %v2235_v40 = vadd.f32 %v2231_v46, %v1254_v36  ;;  %v2643_v47 = vpop.f32.mrb[17].mxu1 }
0x2a8b   :  { %2877 = vtanh.f32 %v2235_v40  ;;  %v2354_v17 = vmul.f32 -1.442695, %v2235_v40 }
0x2a8d   :  { %2879 = vpow2.f32 %v2354_v17 }
0x2a95   :  { %v2878_v7 = vpop.eup %2877 }
0x2a96   :  { %2249 = vrot.lane.b32.xlu1 %v2878_v7, %s2889_s28 }
0x2a97   :  { %v2880_v48 = vpop.eup %2879 }
0x2a98   :  { %v2239_v4 = vadd.f32 1.0, %v2880_v48 }
0x2a9a   :  { %2881 = vrcp.f32 %v2239_v4 }
0x2aa4   :  { %v2882_v63 = vpop.eup %2881 }
0x2aa5   :  { %v2247_v53 = vmul.f32 %v2882_v63, %v2245_v49 }
0x2b08   :  { %v2250_v0 = vpop.permute.xlu1 %2249 }
0x2b09   :  { %v2252_v20 = vmul.f32 %v2882_v63, %v2250_v0 }
0x2b0b   :  { %2254 = vrot.lane.b32.xlu1 %v2252_v20, %s2890_s29 }
0x2b0f   :  { %2264 = vrot.lane.b32.xlu1 %v2158_v34, %s2891_s7 }
0x2b13   :  { %1519 = vrot.lane.b32.xlu1 %v1517_v39, %s2890_s29 }
0x2b17   :  { %1773 = vrot.lane.b32.xlu1 %v1771_v1, %s2890_s29 }
0x2b1b   :  { %2027 = vrot.lane.b32.xlu1 %v2025_v59, %s2890_s29 }
0x2b7d   :  { %v2255_v54 = vpop.permute.xlu1 %2254 }
0x2b7e   :  { %v2257_v55 = vadd.f32 %v2255_v54, %v2247_v53 }
0x2b80   :  { %2883 = vtanh.f32 %v2257_v55  ;;  %v2273_v61 = vsel %vm1075_vm4, %v2257_v55, %v2245_v49 }
0x2b81   :  { %v2265_v52 = vpop.permute.xlu1 %2264 }
0x2b85   :  { %v1520_v45 = vpop.permute.xlu1 %1519 }
0x2b86   :  { %2337 = vst.msk [vmem:[%s3593_s5 + $0x8] sm:$0xff] %vm25_vm0, %v1520_v45 }
0x2b89   :  { %v1774_v50 = vpop.permute.xlu1 %1773 }
0x2b8a   :  { %v2884_v8 = vpop.eup %2883  ;;  %2343 = vst.msk [vmem:[%s3593_s5 + $0x18] sm:$0xff] %vm25_vm0, %v1774_v50 }
0x2b8b   :  { %2260 = vrot.lane.b32.xlu0 %v2884_v8, %s2889_s28 }
0x2b8d   :  { %v2028_v51 = vpop.permute.xlu1 %2027 }
0x2b8e   :  { %2349 = vst.msk [vmem:[%s3593_s5 + $0x28] sm:$0xff] %vm25_vm0, %v2028_v51 }
0x2b8f   :  { %1392 = vrot.lane.b32.xlu0 %v1390_v56, %s2890_s29 }
0x2b93   :  { %1646 = vrot.lane.b32.xlu0 %v1644_v57, %s2890_s29 }
0x2b97   :  { %1900 = vrot.lane.b32.xlu0 %v1898_v58, %s2890_s29 }
0x2b9b   :  { %2154 = vrot.lane.b32.xlu0 %v2152_v29, %s2890_s29 }
0x2b9f   :  { %2275 = vrot.lane.b32.xlu0 %v2273_v61, %s2891_s7 }
0x2bfd   :  { %v2261_v21 = vpop.permute.xlu0 %2260 }
0x2bfe   :  { %v2263_v2 = vmul.f32 %v2882_v63, %v2261_v21 }
0x2c00   :  { %v2267_v6 = vsel %vm1075_vm4, %v2263_v2, %v2265_v52  ;;  %v2279_v25 = vsel %vm1075_vm4, %v2263_v2, 0.0 }
0x2c01   :  { %2269 = vrot.lane.b32.xlu1 %v2267_v6, %s2890_s29  ;;  %v1393_v22 = vpop.permute.xlu0 %1392 }
0x2c02   :  { %1395 = vst.msk [vmem:[%s3593_s5] sm:$0xff] %vm25_vm0, %v1393_v22 }
0x2c05   :  { %2281 = vrot.lane.b32.xlu1 %v2279_v25, %s2890_s29  ;;  %v1647_v43 = vpop.permute.xlu0 %1646 }
0x2c06   :  { %2340 = vst.msk [vmem:[%s3593_s5 + $0x10] sm:$0xff] %vm25_vm0, %v1647_v43 }
0x2c09   :  { %v1901_v9 = vpop.permute.xlu0 %1900 }
0x2c0a   :  { %2346 = vst.msk [vmem:[%s3593_s5 + $0x20] sm:$0xff] %vm25_vm0, %v1901_v9 }
0x2c0d   :  { %v2155_v10 = vpop.permute.xlu0 %2154 }
0x2c0e   :  { %2352 = vst.msk [vmem:[%s3593_s5 + $0x30] sm:$0xff] %vm25_vm0, %v2155_v10 }
0x2c11   :  { %v2276_v44 = vpop.permute.xlu0 %2275 }
0x2c12   :  { %2278 = vst.msk [vmem:[#allocation3] sm:$0xff] %vm25_vm0, %v2276_v44 }
0x2c73   :  { %v2270_v11 = vpop.permute.xlu1 %2269 }
0x2c74   :  { %2272 = vst.msk [vmem:[#allocation2] sm:$0xff] %vm25_vm0, %v2270_v11 }
0x2c77   :  { %v2282_v12 = vpop.permute.xlu1 %2281 }
0x2c78   :  { %2355 = vst.msk [vmem:[%s3593_s5 + $0x38] sm:$0xff] %vm25_vm0, %v2282_v12 }

</bundles_post_ra>
